<compile_context>
chip_gen: v5e
topology: v5e:2x2
jax: 0.10.0
libtpu: 0.0.40
codegen_flags: <defaults>
</compile_context>

<pallas_src>
import functools

import jax
import jax.numpy as jnp
import numpy as np
from jax import lax
from jax.experimental import pallas as pl
from jax.experimental.pallas import tpu as pltpu

MXU_DTYPE = jnp.bfloat16   # MXU operand dtype; accumulation + elementwise stay f32


# ---------------------------------------------------------------------------
# Fused ConvSequence kernel (one batch image per grid step)
# ---------------------------------------------------------------------------
def _make_fused_kernel(H, W, Cin, Cout):
    Ho, Wo = (H + 1) // 2, (W + 1) // 2

    def conv3(x_bf, w_ref, b_ref):
        """3x3 conv, padding=1, on a lane-dense (rows, Wdim*cin) bf16 activation.

        w_ref: (3, Wdim*cin, Wdim*cout) block-tridiagonal weights (kw folded in), bf16.
        b_ref: (1, Wdim*cout) f32 tiled bias.
        Row padding -> 1-row shifts against a zero row; W padding lives inside w_ref.
        """
        zrow = jnp.zeros((1, x_bf.shape[1]), x_bf.dtype)
        x_dn = jnp.concatenate([zrow, x_bf[:-1, :]], axis=0)   # kh = 0 tap (row above)
        x_up = jnp.concatenate([x_bf[1:, :], zrow], axis=0)    # kh = 2 tap (row below)
        acc = jnp.dot(x_dn, w_ref[0], preferred_element_type=jnp.float32)
        acc = acc + jnp.dot(x_bf, w_ref[1], preferred_element_type=jnp.float32)
        acc = acc + jnp.dot(x_up, w_ref[2], preferred_element_type=jnp.float32)
        return acc + b_ref[...]

    def kernel(x_ref, w0_ref, b0_ref,
               w00_ref, b00_ref, w01_ref, b01_ref,
               w10_ref, b10_ref, w11_ref, b11_ref,
               srow_ref, scl_ref, scc_ref, scr_ref,
               o_ref):
        # ---------------- conv (Cin -> Cout), padding=1 ---------------------------
        y = conv3(x_ref[0], w0_ref, b0_ref)                       # (H, W*Cout) f32

        # ---------------- max_pool2d(kernel=3, stride=2, padding=1), separable ----
        # Row direction: 3-max of edge-replicated row shifts (identical to -inf
        # padding because every pool window contains >= 1 real row).
        y_dn = jnp.concatenate([y[:1, :], y[:-1, :]], axis=0)
        y_up = jnp.concatenate([y[1:, :], y[-1:, :]], axis=0)
        rmax = jnp.maximum(jnp.maximum(y, y_dn), y_up)            # (H, W*Cout)
        # Stride-2 row subsample: 0/1 matmul on the (idle) MXU.
        t = jnp.dot(srow_ref[...], rmax.astype(MXU_DTYPE),
                    preferred_element_type=jnp.float32)           # (Ho, W*Cout)
        # Column direction: 3-max + stride-2 subsample via three 0/1 selection
        # matmuls (left / center / right taps; out-of-range taps duplicate the
        # center column, which is a no-op under max).  No lane rotations, no -inf.
        t_bf = t.astype(MXU_DTYPE)
        p_l = jnp.dot(t_bf, scl_ref[...], preferred_element_type=jnp.float32)
        p_c = jnp.dot(t_bf, scc_ref[...], preferred_element_type=jnp.float32)
        p_r = jnp.dot(t_bf, scr_ref[...], preferred_element_type=jnp.float32)
        x = jnp.maximum(jnp.maximum(p_l, p_c), p_r)               # (Ho, Wo*Cout) f32

        # ---------------- residual blocks: x + conv1(relu(conv0(relu(x)))) --------
        def res_block(xin, wa_ref, ba_ref, wb_ref, bb_ref):
            h = jnp.maximum(xin, 0.0).astype(MXU_DTYPE)
            h = conv3(h, wa_ref, ba_ref)
            h = jnp.maximum(h, 0.0).astype(MXU_DTYPE)
            h = conv3(h, wb_ref, bb_ref)
            return h + xin                                        # residual add in f32

        x = res_block(x, w00_ref, b00_ref, w01_ref, b01_ref)
        x = res_block(x, w10_ref, b10_ref, w11_ref, b11_ref)
        # TODO(synk): Wo*Cout (=64) < 128 lanes -> masked final store; pad / stack the
        # per-image outputs into a lane-dense slab if this writeback ever matters.
        o_ref[0] = x.astype(o_ref.dtype)

    return kernel


# ---------------------------------------------------------------------------
# Wrapper-side weight / selection-matrix preparation (one-time glue)
# ---------------------------------------------------------------------------
def _expand_conv_weight_tridiag(w_hwio, Wdim, dtype):
    """(3,3,Cin,Cout) HWIO -> (3, Wdim*Cin, Wdim*Cout) block-tridiagonal (kw folded)."""
    cin, cout = w_hwio.shape[2], w_hwio.shape[3]
    sel = np.zeros((3, Wdim, Wdim), np.float32)        # sel[kw, j_in, j_out]
    for kw in range(3):
        for jout in range(Wdim):
            jin = jout + kw - 1
            if 0 <= jin < Wdim:
                sel[kw, jin, jout] = 1.0
    e = jnp.einsum('kuv,hkio->huivo', jnp.asarray(sel), w_hwio)   # (3, W, Cin, W, Cout)
    return e.reshape(3, Wdim * cin, Wdim * cout).astype(dtype)


def _tile_bias(b, Wdim):
    return jnp.tile(b, Wdim).reshape(1, Wdim * b.shape[0])        # f32


def _pool_selection_mats(H, W, C, dtype):
    """0/1 matrices: stride-2 row subsample + (left/center/right) column taps."""
    Ho, Wo = (H + 1) // 2, (W + 1) // 2
    srow = np.zeros((Ho, H), np.float32)
    srow[np.arange(Ho), 2 * np.arange(Ho)] = 1.0

    def sel(col_of):
        s = np.zeros((W * C, Wo * C), np.float32)
        for jo in range(Wo):
            jin = col_of(jo)
            for c in range(C):
                s[jin * C + c, jo * C + c] = 1.0
        return s

    scl = sel(lambda jo: max(2 * jo - 1, 0))          # left tap (clamped -> duplicate)
    scc = sel(lambda jo: 2 * jo)                      # center tap
    scr = sel(lambda jo: min(2 * jo + 1, W - 1))      # right tap (clamped -> duplicate)
    return (jnp.asarray(srow, dtype), jnp.asarray(scl, dtype),
            jnp.asarray(scc, dtype), jnp.asarray(scr, dtype))


# ---------------------------------------------------------------------------
# ConvSequence forward (PyTorch-equivalent, NCHW in / NCHW out)
# ---------------------------------------------------------------------------
def conv_sequence_forward(x_nchw, params):
    N, Cin, H, W = x_nchw.shape
    Cout = params["conv_w"].shape[-1]
    Ho, Wo = (H + 1) // 2, (W + 1) // 2

    # NCHW -> lane-dense (N, H, W*Cin); cast the MXU operand to bf16.
    x = jnp.transpose(x_nchw, (0, 2, 3, 1)).reshape(N, H, W * Cin).astype(MXU_DTYPE)

    # One-time block-tridiagonal weight expansion (bf16) + tiled f32 biases.
    w0 = _expand_conv_weight_tridiag(params["conv_w"], W, MXU_DTYPE)
    b0 = _tile_bias(params["conv_b"], W)
    w00 = _expand_conv_weight_tridiag(params["rb0_c0_w"], Wo, MXU_DTYPE)
    b00 = _tile_bias(params["rb0_c0_b"], Wo)
    w01 = _expand_conv_weight_tridiag(params["rb0_c1_w"], Wo, MXU_DTYPE)
    b01 = _tile_bias(params["rb0_c1_b"], Wo)
    w10 = _expand_conv_weight_tridiag(params["rb1_c0_w"], Wo, MXU_DTYPE)
    b10 = _tile_bias(params["rb1_c0_b"], Wo)
    w11 = _expand_conv_weight_tridiag(params["rb1_c1_w"], Wo, MXU_DTYPE)
    b11 = _tile_bias(params["rb1_c1_b"], Wo)
    srow, scl, scc, scr = _pool_selection_mats(H, W, Cout, MXU_DTYPE)

    kernel = _make_fused_kernel(H, W, Cin, Cout)

    def full_spec(a):
        nd = a.ndim
        return pl.BlockSpec(a.shape, lambda n, _nd=nd: (0,) * _nd)

    in_specs = [
        pl.BlockSpec((1, H, W * Cin), lambda n: (n, 0, 0)),
        full_spec(w0), full_spec(b0),
        full_spec(w00), full_spec(b00), full_spec(w01), full_spec(b01),
        full_spec(w10), full_spec(b10), full_spec(w11), full_spec(b11),
        full_spec(srow), full_spec(scl), full_spec(scc), full_spec(scr),
    ]

    out = pl.pallas_call(
        kernel,
        out_shape=jax.ShapeDtypeStruct((N, Ho, Wo * Cout), jnp.float32),
        grid=(N,),
        in_specs=in_specs,
        out_specs=pl.BlockSpec((1, Ho, Wo * Cout), lambda n: (n, 0, 0)),
        compiler_params=pltpu.CompilerParams(
            dimension_semantics=("parallel",),          # v7x: one image per TensorCore
            vmem_limit_bytes=32 * 1024 * 1024,
        ),
    )(x, w0, b0, w00, b00, w01, b01, w10, b10, w11, b11, srow, scl, scc, scr)

    # lane-dense (N, Ho, Wo*Cout) -> NCHW glue.
    return jnp.transpose(out.reshape(N, Ho, Wo, Cout), (0, 3, 1, 2))


# ---------------------------------------------------------------------------
# Pure-JAX reference (correctness check), NCHW like PyTorch, full f32
# ---------------------------------------------------------------------------
def _ref_conv(x, w_hwio, b):
    w_oihw = jnp.transpose(w_hwio, (3, 2, 0, 1))
    y = lax.conv_general_dilated(
        x, w_oihw, window_strides=(1, 1), padding=((1, 1), (1, 1)),
        dimension_numbers=("NCHW", "OIHW", "NCHW"))
    return y + b.reshape(1, -1, 1, 1)


def _ref_forward(x, p):
    x = _ref_conv(x, p["conv_w"], p["conv_b"])
    x = lax.reduce_window(x, -jnp.inf, lax.max,
                          window_dimensions=(1, 1, 3, 3),
                          window_strides=(1, 1, 2, 2),
                          padding=((0, 0), (0, 0), (1, 1), (1, 1)))
    for blk in ("rb0", "rb1"):
        inp = x
        h = _ref_conv(jnp.maximum(x, 0.0), p[f"{blk}_c0_w"], p[f"{blk}_c0_b"])
        h = _ref_conv(jnp.maximum(h, 0.0), p[f"{blk}_c1_w"], p[f"{blk}_c1_b"])
        x = h + inp
    return x


# ---------------------------------------------------------------------------
# Deterministic parameter init (mimics PyTorch default Conv2d init bounds)
# ---------------------------------------------------------------------------
def init_params(key, in_channels, out_channels):
    def init_conv(k, cin, cout):
        kw, kb = jax.random.split(k)
        bound = 1.0 / np.sqrt(cin * 9)
        w = jax.random.uniform(kw, (3, 3, cin, cout), jnp.float32, -bound, bound)
        b = jax.random.uniform(kb, (cout,), jnp.float32, -bound, bound)
        return w, b

    keys = jax.random.split(key, 5)
    p = {}
    p["conv_w"], p["conv_b"] = init_conv(keys[0], in_channels, out_channels)
    p["rb0_c0_w"], p["rb0_c0_b"] = init_conv(keys[1], out_channels, out_channels)
    p["rb0_c1_w"], p["rb0_c1_b"] = init_conv(keys[2], out_channels, out_channels)
    p["rb1_c0_w"], p["rb1_c0_b"] = init_conv(keys[3], out_channels, out_channels)
    p["rb1_c1_w"], p["rb1_c1_b"] = init_conv(keys[4], out_channels, out_channels)
    return p


if __name__ == "__main__":
    # Small ConvSequence: input_shape=(4, 16, 16), out_channels=8, batch=2.
    batch, in_c, H, W = 2, 4, 16, 16
    out_c = 8

    key = jax.random.PRNGKey(0)
    k_x, k_p = jax.random.split(key)
    x = jax.random.normal(k_x, (batch, in_c, H, W), jnp.float32)  # NCHW like PyTorch
    params = init_params(k_p, in_c, out_c)

    fwd = jax.jit(functools.partial(conv_sequence_forward, params=params))
    out = jax.block_until_ready(fwd(x))

    # Matches ConvSequence.get_output_shape() == (out_c, (H+1)//2, (W+1)//2)
    assert out.shape == (batch, out_c, (H + 1) // 2, (W + 1) // 2), out.shape

    # Reference is pure f32; kernel uses bf16 MXU operands with f32 accumulation,
    # so compare at bf16-appropriate tolerance.
    ref = jax.block_until_ready(_ref_forward(x, params))
    max_err = float(np.max(np.abs(np.asarray(out) - np.asarray(ref))))
    assert np.allclose(np.asarray(out), np.asarray(ref), atol=5e-2, rtol=3e-2), max_err

    print("KERNEL_OK")
</pallas_src>

<mosaic_0001>
module attributes {stable_mosaic.version = 11 : i64} {
  func.func @kernel(%arg0: i32, %arg1: memref<1x16x64xbf16, #tpu.memory_space<vmem>>, %arg2: memref<3x64x128xbf16, #tpu.memory_space<vmem>>, %arg3: memref<1x128xf32, #tpu.memory_space<vmem>>, %arg4: memref<3x64x64xbf16, #tpu.memory_space<vmem>>, %arg5: memref<1x64xf32, #tpu.memory_space<vmem>>, %arg6: memref<3x64x64xbf16, #tpu.memory_space<vmem>>, %arg7: memref<1x64xf32, #tpu.memory_space<vmem>>, %arg8: memref<3x64x64xbf16, #tpu.memory_space<vmem>>, %arg9: memref<1x64xf32, #tpu.memory_space<vmem>>, %arg10: memref<3x64x64xbf16, #tpu.memory_space<vmem>>, %arg11: memref<1x64xf32, #tpu.memory_space<vmem>>, %arg12: memref<8x16xbf16, #tpu.memory_space<vmem>>, %arg13: memref<128x64xbf16, #tpu.memory_space<vmem>>, %arg14: memref<128x64xbf16, #tpu.memory_space<vmem>>, %arg15: memref<128x64xbf16, #tpu.memory_space<vmem>>, %arg16: memref<1x8x64xf32, #tpu.memory_space<vmem>>) attributes {dimension_semantics = [#tpu.dimension_semantics<parallel>], iteration_bounds = array<i64: 2>, scalar_prefetch = 0 : i64, scratch_operands = 0 : i64, tpu.core_type = #tpu.core_type<tc>, window_params = [{transform_indices = @transform_0, window_bounds = array<i64: 1, 16, 64>}, {pipeline_mode = #tpu.pipeline_mode<synchronous>, transform_indices = @transform_1, window_bounds = array<i64: 3, 64, 128>}, {pipeline_mode = #tpu.pipeline_mode<synchronous>, transform_indices = @transform_2, window_bounds = array<i64: 1, 128>}, {pipeline_mode = #tpu.pipeline_mode<synchronous>, transform_indices = @transform_3, window_bounds = array<i64: 3, 64, 64>}, {pipeline_mode = #tpu.pipeline_mode<synchronous>, transform_indices = @transform_4, window_bounds = array<i64: 1, 64>}, {pipeline_mode = #tpu.pipeline_mode<synchronous>, transform_indices = @transform_5, window_bounds = array<i64: 3, 64, 64>}, {pipeline_mode = #tpu.pipeline_mode<synchronous>, transform_indices = @transform_6, window_bounds = array<i64: 1, 64>}, {pipeline_mode = #tpu.pipeline_mode<synchronous>, transform_indices = @transform_7, window_bounds = array<i64: 3, 64, 64>}, {pipeline_mode = #tpu.pipeline_mode<synchronous>, transform_indices = @transform_8, window_bounds = array<i64: 1, 64>}, {pipeline_mode = #tpu.pipeline_mode<synchronous>, transform_indices = @transform_9, window_bounds = array<i64: 3, 64, 64>}, {pipeline_mode = #tpu.pipeline_mode<synchronous>, transform_indices = @transform_10, window_bounds = array<i64: 1, 64>}, {pipeline_mode = #tpu.pipeline_mode<synchronous>, transform_indices = @transform_11, window_bounds = array<i64: 8, 16>}, {pipeline_mode = #tpu.pipeline_mode<synchronous>, transform_indices = @transform_12, window_bounds = array<i64: 128, 64>}, {pipeline_mode = #tpu.pipeline_mode<synchronous>, transform_indices = @transform_13, window_bounds = array<i64: 128, 64>}, {pipeline_mode = #tpu.pipeline_mode<synchronous>, transform_indices = @transform_14, window_bounds = array<i64: 128, 64>}, {transform_indices = @transform_15, window_bounds = array<i64: 1, 8, 64>}]} {
    %c0 = arith.constant 0 : index
    %c0_0 = arith.constant 0 : index
    %c0_1 = arith.constant 0 : index
    %0 = vector.load %arg1[%c0, %c0_0, %c0_1] : memref<1x16x64xbf16, #tpu.memory_space<vmem>>, vector<1x16x64xbf16>
    %1 = vector.shape_cast %0 : vector<1x16x64xbf16> to vector<16x64xbf16>
    %cst = arith.constant 0.000000e+00 : bf16
    %2 = vector.broadcast %cst : bf16 to vector<1x64xbf16>
    %3 = vector.extract_strided_slice %1 {offsets = [0, 0], sizes = [15, 64], strides = [1, 1]} : vector<16x64xbf16> to vector<15x64xbf16>
    %4 = tpu.concatenate %2, %3 in 0 : vector<1x64xbf16>, vector<15x64xbf16> -> vector<16x64xbf16>
    %5 = vector.extract_strided_slice %1 {offsets = [1, 0], sizes = [15, 64], strides = [1, 1]} : vector<16x64xbf16> to vector<15x64xbf16>
    %6 = tpu.concatenate %5, %2 in 0 : vector<15x64xbf16>, vector<1x64xbf16> -> vector<16x64xbf16>
    %c0_2 = arith.constant 0 : index
    %c0_3 = arith.constant 0 : index
    %c0_4 = arith.constant 0 : index
    %7 = vector.load %arg2[%c0_2, %c0_3, %c0_4] : memref<3x64x128xbf16, #tpu.memory_space<vmem>>, vector<1x64x128xbf16>
    %8 = vector.shape_cast %7 : vector<1x64x128xbf16> to vector<64x128xbf16>
    %cst_5 = arith.constant dense<0.000000e+00> : vector<16x128xf32>
    %9 = tpu.matmul %4, %8, %cst_5 {dimension_numbers = #tpu.dot_dimension_numbers<[1], [0], [0], [1], [0, 0, 1, 1], [], []>} : vector<16x64xbf16>, vector<64x128xbf16>, vector<16x128xf32> -> vector<16x128xf32>
    %c1 = arith.constant 1 : index
    %c0_6 = arith.constant 0 : index
    %c0_7 = arith.constant 0 : index
    %10 = vector.load %arg2[%c1, %c0_6, %c0_7] : memref<3x64x128xbf16, #tpu.memory_space<vmem>>, vector<1x64x128xbf16>
    %11 = vector.shape_cast %10 : vector<1x64x128xbf16> to vector<64x128xbf16>
    %cst_8 = arith.constant dense<0.000000e+00> : vector<16x128xf32>
    %12 = tpu.matmul %1, %11, %cst_8 {dimension_numbers = #tpu.dot_dimension_numbers<[1], [0], [0], [1], [0, 0, 1, 1], [], []>} : vector<16x64xbf16>, vector<64x128xbf16>, vector<16x128xf32> -> vector<16x128xf32>
    %13 = arith.addf %9, %12 : vector<16x128xf32>
    %c2 = arith.constant 2 : index
    %c0_9 = arith.constant 0 : index
    %c0_10 = arith.constant 0 : index
    %14 = vector.load %arg2[%c2, %c0_9, %c0_10] : memref<3x64x128xbf16, #tpu.memory_space<vmem>>, vector<1x64x128xbf16>
    %15 = vector.shape_cast %14 : vector<1x64x128xbf16> to vector<64x128xbf16>
    %cst_11 = arith.constant dense<0.000000e+00> : vector<16x128xf32>
    %16 = tpu.matmul %6, %15, %cst_11 {dimension_numbers = #tpu.dot_dimension_numbers<[1], [0], [0], [1], [0, 0, 1, 1], [], []>} : vector<16x64xbf16>, vector<64x128xbf16>, vector<16x128xf32> -> vector<16x128xf32>
    %17 = arith.addf %13, %16 : vector<16x128xf32>
    %c0_12 = arith.constant 0 : index
    %c0_13 = arith.constant 0 : index
    %18 = vector.load %arg3[%c0_12, %c0_13] : memref<1x128xf32, #tpu.memory_space<vmem>>, vector<1x128xf32>
    %19 = vector.broadcast %18 : vector<1x128xf32> to vector<16x128xf32>
    %20 = arith.addf %17, %19 : vector<16x128xf32>
    %21 = vector.extract_strided_slice %20 {offsets = [0, 0], sizes = [1, 128], strides = [1, 1]} : vector<16x128xf32> to vector<1x128xf32>
    %22 = vector.extract_strided_slice %20 {offsets = [0, 0], sizes = [15, 128], strides = [1, 1]} : vector<16x128xf32> to vector<15x128xf32>
    %23 = tpu.concatenate %21, %22 in 0 : vector<1x128xf32>, vector<15x128xf32> -> vector<16x128xf32>
    %24 = vector.extract_strided_slice %20 {offsets = [1, 0], sizes = [15, 128], strides = [1, 1]} : vector<16x128xf32> to vector<15x128xf32>
    %25 = vector.extract_strided_slice %20 {offsets = [15, 0], sizes = [1, 128], strides = [1, 1]} : vector<16x128xf32> to vector<1x128xf32>
    %26 = tpu.concatenate %24, %25 in 0 : vector<15x128xf32>, vector<1x128xf32> -> vector<16x128xf32>
    %27 = arith.maximumf %20, %23 : vector<16x128xf32>
    %28 = arith.maximumf %27, %26 : vector<16x128xf32>
    %c0_14 = arith.constant 0 : index
    %c0_15 = arith.constant 0 : index
    %29 = vector.load %arg12[%c0_14, %c0_15] : memref<8x16xbf16, #tpu.memory_space<vmem>>, vector<8x16xbf16>
    %30 = arith.truncf %28 : vector<16x128xf32> to vector<16x128xbf16>
    %cst_16 = arith.constant dense<0.000000e+00> : vector<8x128xf32>
    %31 = tpu.matmul %29, %30, %cst_16 {dimension_numbers = #tpu.dot_dimension_numbers<[1], [0], [0], [1], [0, 0, 1, 1], [], []>} : vector<8x16xbf16>, vector<16x128xbf16>, vector<8x128xf32> -> vector<8x128xf32>
    %32 = arith.truncf %31 : vector<8x128xf32> to vector<8x128xbf16>
    %c0_17 = arith.constant 0 : index
    %c0_18 = arith.constant 0 : index
    %33 = vector.load %arg13[%c0_17, %c0_18] : memref<128x64xbf16, #tpu.memory_space<vmem>>, vector<128x64xbf16>
    %cst_19 = arith.constant dense<0.000000e+00> : vector<8x64xf32>
    %34 = tpu.matmul %32, %33, %cst_19 {dimension_numbers = #tpu.dot_dimension_numbers<[1], [0], [0], [1], [0, 0, 1, 1], [], []>} : vector<8x128xbf16>, vector<128x64xbf16>, vector<8x64xf32> -> vector<8x64xf32>
    %c0_20 = arith.constant 0 : index
    %c0_21 = arith.constant 0 : index
    %35 = vector.load %arg14[%c0_20, %c0_21] : memref<128x64xbf16, #tpu.memory_space<vmem>>, vector<128x64xbf16>
    %cst_22 = arith.constant dense<0.000000e+00> : vector<8x64xf32>
    %36 = tpu.matmul %32, %35, %cst_22 {dimension_numbers = #tpu.dot_dimension_numbers<[1], [0], [0], [1], [0, 0, 1, 1], [], []>} : vector<8x128xbf16>, vector<128x64xbf16>, vector<8x64xf32> -> vector<8x64xf32>
    %c0_23 = arith.constant 0 : index
    %c0_24 = arith.constant 0 : index
    %37 = vector.load %arg15[%c0_23, %c0_24] : memref<128x64xbf16, #tpu.memory_space<vmem>>, vector<128x64xbf16>
    %cst_25 = arith.constant dense<0.000000e+00> : vector<8x64xf32>
    %38 = tpu.matmul %32, %37, %cst_25 {dimension_numbers = #tpu.dot_dimension_numbers<[1], [0], [0], [1], [0, 0, 1, 1], [], []>} : vector<8x128xbf16>, vector<128x64xbf16>, vector<8x64xf32> -> vector<8x64xf32>
    %39 = arith.maximumf %34, %36 : vector<8x64xf32>
    %40 = arith.maximumf %39, %38 : vector<8x64xf32>
    %cst_26 = arith.constant 0.000000e+00 : f32
    %41 = vector.broadcast %cst_26 : f32 to vector<8x64xf32>
    %42 = arith.maximumf %40, %41 : vector<8x64xf32>
    %43 = arith.truncf %42 : vector<8x64xf32> to vector<8x64xbf16>
    %cst_27 = arith.constant 0.000000e+00 : bf16
    %44 = vector.broadcast %cst_27 : bf16 to vector<1x64xbf16>
    %45 = vector.extract_strided_slice %43 {offsets = [0, 0], sizes = [7, 64], strides = [1, 1]} : vector<8x64xbf16> to vector<7x64xbf16>
    %46 = tpu.concatenate %44, %45 in 0 : vector<1x64xbf16>, vector<7x64xbf16> -> vector<8x64xbf16>
    %47 = vector.extract_strided_slice %43 {offsets = [1, 0], sizes = [7, 64], strides = [1, 1]} : vector<8x64xbf16> to vector<7x64xbf16>
    %48 = tpu.concatenate %47, %44 in 0 : vector<7x64xbf16>, vector<1x64xbf16> -> vector<8x64xbf16>
    %c0_28 = arith.constant 0 : index
    %c0_29 = arith.constant 0 : index
    %c0_30 = arith.constant 0 : index
    %49 = vector.load %arg4[%c0_28, %c0_29, %c0_30] : memref<3x64x64xbf16, #tpu.memory_space<vmem>>, vector<1x64x64xbf16>
    %50 = vector.shape_cast %49 : vector<1x64x64xbf16> to vector<64x64xbf16>
    %cst_31 = arith.constant dense<0.000000e+00> : vector<8x64xf32>
    %51 = tpu.matmul %46, %50, %cst_31 {dimension_numbers = #tpu.dot_dimension_numbers<[1], [0], [0], [1], [0, 0, 1, 1], [], []>} : vector<8x64xbf16>, vector<64x64xbf16>, vector<8x64xf32> -> vector<8x64xf32>
    %c1_32 = arith.constant 1 : index
    %c0_33 = arith.constant 0 : index
    %c0_34 = arith.constant 0 : index
    %52 = vector.load %arg4[%c1_32, %c0_33, %c0_34] : memref<3x64x64xbf16, #tpu.memory_space<vmem>>, vector<1x64x64xbf16>
    %53 = vector.shape_cast %52 : vector<1x64x64xbf16> to vector<64x64xbf16>
    %cst_35 = arith.constant dense<0.000000e+00> : vector<8x64xf32>
    %54 = tpu.matmul %43, %53, %cst_35 {dimension_numbers = #tpu.dot_dimension_numbers<[1], [0], [0], [1], [0, 0, 1, 1], [], []>} : vector<8x64xbf16>, vector<64x64xbf16>, vector<8x64xf32> -> vector<8x64xf32>
    %55 = arith.addf %51, %54 : vector<8x64xf32>
    %c2_36 = arith.constant 2 : index
    %c0_37 = arith.constant 0 : index
    %c0_38 = arith.constant 0 : index
    %56 = vector.load %arg4[%c2_36, %c0_37, %c0_38] : memref<3x64x64xbf16, #tpu.memory_space<vmem>>, vector<1x64x64xbf16>
    %57 = vector.shape_cast %56 : vector<1x64x64xbf16> to vector<64x64xbf16>
    %cst_39 = arith.constant dense<0.000000e+00> : vector<8x64xf32>
    %58 = tpu.matmul %48, %57, %cst_39 {dimension_numbers = #tpu.dot_dimension_numbers<[1], [0], [0], [1], [0, 0, 1, 1], [], []>} : vector<8x64xbf16>, vector<64x64xbf16>, vector<8x64xf32> -> vector<8x64xf32>
    %59 = arith.addf %55, %58 : vector<8x64xf32>
    %c0_40 = arith.constant 0 : index
    %c0_41 = arith.constant 0 : index
    %60 = vector.load %arg5[%c0_40, %c0_41] : memref<1x64xf32, #tpu.memory_space<vmem>>, vector<1x64xf32>
    %61 = vector.broadcast %60 : vector<1x64xf32> to vector<8x64xf32>
    %62 = arith.addf %59, %61 : vector<8x64xf32>
    %cst_42 = arith.constant 0.000000e+00 : f32
    %63 = vector.broadcast %cst_42 : f32 to vector<8x64xf32>
    %64 = arith.maximumf %62, %63 : vector<8x64xf32>
    %65 = arith.truncf %64 : vector<8x64xf32> to vector<8x64xbf16>
    %cst_43 = arith.constant 0.000000e+00 : bf16
    %66 = vector.broadcast %cst_43 : bf16 to vector<1x64xbf16>
    %67 = vector.extract_strided_slice %65 {offsets = [0, 0], sizes = [7, 64], strides = [1, 1]} : vector<8x64xbf16> to vector<7x64xbf16>
    %68 = tpu.concatenate %66, %67 in 0 : vector<1x64xbf16>, vector<7x64xbf16> -> vector<8x64xbf16>
    %69 = vector.extract_strided_slice %65 {offsets = [1, 0], sizes = [7, 64], strides = [1, 1]} : vector<8x64xbf16> to vector<7x64xbf16>
    %70 = tpu.concatenate %69, %66 in 0 : vector<7x64xbf16>, vector<1x64xbf16> -> vector<8x64xbf16>
    %c0_44 = arith.constant 0 : index
    %c0_45 = arith.constant 0 : index
    %c0_46 = arith.constant 0 : index
    %71 = vector.load %arg6[%c0_44, %c0_45, %c0_46] : memref<3x64x64xbf16, #tpu.memory_space<vmem>>, vector<1x64x64xbf16>
    %72 = vector.shape_cast %71 : vector<1x64x64xbf16> to vector<64x64xbf16>
    %cst_47 = arith.constant dense<0.000000e+00> : vector<8x64xf32>
    %73 = tpu.matmul %68, %72, %cst_47 {dimension_numbers = #tpu.dot_dimension_numbers<[1], [0], [0], [1], [0, 0, 1, 1], [], []>} : vector<8x64xbf16>, vector<64x64xbf16>, vector<8x64xf32> -> vector<8x64xf32>
    %c1_48 = arith.constant 1 : index
    %c0_49 = arith.constant 0 : index
    %c0_50 = arith.constant 0 : index
    %74 = vector.load %arg6[%c1_48, %c0_49, %c0_50] : memref<3x64x64xbf16, #tpu.memory_space<vmem>>, vector<1x64x64xbf16>
    %75 = vector.shape_cast %74 : vector<1x64x64xbf16> to vector<64x64xbf16>
    %cst_51 = arith.constant dense<0.000000e+00> : vector<8x64xf32>
    %76 = tpu.matmul %65, %75, %cst_51 {dimension_numbers = #tpu.dot_dimension_numbers<[1], [0], [0], [1], [0, 0, 1, 1], [], []>} : vector<8x64xbf16>, vector<64x64xbf16>, vector<8x64xf32> -> vector<8x64xf32>
    %77 = arith.addf %73, %76 : vector<8x64xf32>
    %c2_52 = arith.constant 2 : index
    %c0_53 = arith.constant 0 : index
    %c0_54 = arith.constant 0 : index
    %78 = vector.load %arg6[%c2_52, %c0_53, %c0_54] : memref<3x64x64xbf16, #tpu.memory_space<vmem>>, vector<1x64x64xbf16>
    %79 = vector.shape_cast %78 : vector<1x64x64xbf16> to vector<64x64xbf16>
    %cst_55 = arith.constant dense<0.000000e+00> : vector<8x64xf32>
    %80 = tpu.matmul %70, %79, %cst_55 {dimension_numbers = #tpu.dot_dimension_numbers<[1], [0], [0], [1], [0, 0, 1, 1], [], []>} : vector<8x64xbf16>, vector<64x64xbf16>, vector<8x64xf32> -> vector<8x64xf32>
    %81 = arith.addf %77, %80 : vector<8x64xf32>
    %c0_56 = arith.constant 0 : index
    %c0_57 = arith.constant 0 : index
    %82 = vector.load %arg7[%c0_56, %c0_57] : memref<1x64xf32, #tpu.memory_space<vmem>>, vector<1x64xf32>
    %83 = vector.broadcast %82 : vector<1x64xf32> to vector<8x64xf32>
    %84 = arith.addf %81, %83 : vector<8x64xf32>
    %85 = arith.addf %84, %40 : vector<8x64xf32>
    %cst_58 = arith.constant 0.000000e+00 : f32
    %86 = vector.broadcast %cst_58 : f32 to vector<8x64xf32>
    %87 = arith.maximumf %85, %86 : vector<8x64xf32>
    %88 = arith.truncf %87 : vector<8x64xf32> to vector<8x64xbf16>
    %cst_59 = arith.constant 0.000000e+00 : bf16
    %89 = vector.broadcast %cst_59 : bf16 to vector<1x64xbf16>
    %90 = vector.extract_strided_slice %88 {offsets = [0, 0], sizes = [7, 64], strides = [1, 1]} : vector<8x64xbf16> to vector<7x64xbf16>
    %91 = tpu.concatenate %89, %90 in 0 : vector<1x64xbf16>, vector<7x64xbf16> -> vector<8x64xbf16>
    %92 = vector.extract_strided_slice %88 {offsets = [1, 0], sizes = [7, 64], strides = [1, 1]} : vector<8x64xbf16> to vector<7x64xbf16>
    %93 = tpu.concatenate %92, %89 in 0 : vector<7x64xbf16>, vector<1x64xbf16> -> vector<8x64xbf16>
    %c0_60 = arith.constant 0 : index
    %c0_61 = arith.constant 0 : index
    %c0_62 = arith.constant 0 : index
    %94 = vector.load %arg8[%c0_60, %c0_61, %c0_62] : memref<3x64x64xbf16, #tpu.memory_space<vmem>>, vector<1x64x64xbf16>
    %95 = vector.shape_cast %94 : vector<1x64x64xbf16> to vector<64x64xbf16>
    %cst_63 = arith.constant dense<0.000000e+00> : vector<8x64xf32>
    %96 = tpu.matmul %91, %95, %cst_63 {dimension_numbers = #tpu.dot_dimension_numbers<[1], [0], [0], [1], [0, 0, 1, 1], [], []>} : vector<8x64xbf16>, vector<64x64xbf16>, vector<8x64xf32> -> vector<8x64xf32>
    %c1_64 = arith.constant 1 : index
    %c0_65 = arith.constant 0 : index
    %c0_66 = arith.constant 0 : index
    %97 = vector.load %arg8[%c1_64, %c0_65, %c0_66] : memref<3x64x64xbf16, #tpu.memory_space<vmem>>, vector<1x64x64xbf16>
    %98 = vector.shape_cast %97 : vector<1x64x64xbf16> to vector<64x64xbf16>
    %cst_67 = arith.constant dense<0.000000e+00> : vector<8x64xf32>
    %99 = tpu.matmul %88, %98, %cst_67 {dimension_numbers = #tpu.dot_dimension_numbers<[1], [0], [0], [1], [0, 0, 1, 1], [], []>} : vector<8x64xbf16>, vector<64x64xbf16>, vector<8x64xf32> -> vector<8x64xf32>
    %100 = arith.addf %96, %99 : vector<8x64xf32>
    %c2_68 = arith.constant 2 : index
    %c0_69 = arith.constant 0 : index
    %c0_70 = arith.constant 0 : index
    %101 = vector.load %arg8[%c2_68, %c0_69, %c0_70] : memref<3x64x64xbf16, #tpu.memory_space<vmem>>, vector<1x64x64xbf16>
    %102 = vector.shape_cast %101 : vector<1x64x64xbf16> to vector<64x64xbf16>
    %cst_71 = arith.constant dense<0.000000e+00> : vector<8x64xf32>
    %103 = tpu.matmul %93, %102, %cst_71 {dimension_numbers = #tpu.dot_dimension_numbers<[1], [0], [0], [1], [0, 0, 1, 1], [], []>} : vector<8x64xbf16>, vector<64x64xbf16>, vector<8x64xf32> -> vector<8x64xf32>
    %104 = arith.addf %100, %103 : vector<8x64xf32>
    %c0_72 = arith.constant 0 : index
    %c0_73 = arith.constant 0 : index
    %105 = vector.load %arg9[%c0_72, %c0_73] : memref<1x64xf32, #tpu.memory_space<vmem>>, vector<1x64xf32>
    %106 = vector.broadcast %105 : vector<1x64xf32> to vector<8x64xf32>
    %107 = arith.addf %104, %106 : vector<8x64xf32>
    %cst_74 = arith.constant 0.000000e+00 : f32
    %108 = vector.broadcast %cst_74 : f32 to vector<8x64xf32>
    %109 = arith.maximumf %107, %108 : vector<8x64xf32>
    %110 = arith.truncf %109 : vector<8x64xf32> to vector<8x64xbf16>
    %cst_75 = arith.constant 0.000000e+00 : bf16
    %111 = vector.broadcast %cst_75 : bf16 to vector<1x64xbf16>
    %112 = vector.extract_strided_slice %110 {offsets = [0, 0], sizes = [7, 64], strides = [1, 1]} : vector<8x64xbf16> to vector<7x64xbf16>
    %113 = tpu.concatenate %111, %112 in 0 : vector<1x64xbf16>, vector<7x64xbf16> -> vector<8x64xbf16>
    %114 = vector.extract_strided_slice %110 {offsets = [1, 0], sizes = [7, 64], strides = [1, 1]} : vector<8x64xbf16> to vector<7x64xbf16>
    %115 = tpu.concatenate %114, %111 in 0 : vector<7x64xbf16>, vector<1x64xbf16> -> vector<8x64xbf16>
    %c0_76 = arith.constant 0 : index
    %c0_77 = arith.constant 0 : index
    %c0_78 = arith.constant 0 : index
    %116 = vector.load %arg10[%c0_76, %c0_77, %c0_78] : memref<3x64x64xbf16, #tpu.memory_space<vmem>>, vector<1x64x64xbf16>
    %117 = vector.shape_cast %116 : vector<1x64x64xbf16> to vector<64x64xbf16>
    %cst_79 = arith.constant dense<0.000000e+00> : vector<8x64xf32>
    %118 = tpu.matmul %113, %117, %cst_79 {dimension_numbers = #tpu.dot_dimension_numbers<[1], [0], [0], [1], [0, 0, 1, 1], [], []>} : vector<8x64xbf16>, vector<64x64xbf16>, vector<8x64xf32> -> vector<8x64xf32>
    %c1_80 = arith.constant 1 : index
    %c0_81 = arith.constant 0 : index
    %c0_82 = arith.constant 0 : index
    %119 = vector.load %arg10[%c1_80, %c0_81, %c0_82] : memref<3x64x64xbf16, #tpu.memory_space<vmem>>, vector<1x64x64xbf16>
    %120 = vector.shape_cast %119 : vector<1x64x64xbf16> to vector<64x64xbf16>
    %cst_83 = arith.constant dense<0.000000e+00> : vector<8x64xf32>
    %121 = tpu.matmul %110, %120, %cst_83 {dimension_numbers = #tpu.dot_dimension_numbers<[1], [0], [0], [1], [0, 0, 1, 1], [], []>} : vector<8x64xbf16>, vector<64x64xbf16>, vector<8x64xf32> -> vector<8x64xf32>
    %122 = arith.addf %118, %121 : vector<8x64xf32>
    %c2_84 = arith.constant 2 : index
    %c0_85 = arith.constant 0 : index
    %c0_86 = arith.constant 0 : index
    %123 = vector.load %arg10[%c2_84, %c0_85, %c0_86] : memref<3x64x64xbf16, #tpu.memory_space<vmem>>, vector<1x64x64xbf16>
    %124 = vector.shape_cast %123 : vector<1x64x64xbf16> to vector<64x64xbf16>
    %cst_87 = arith.constant dense<0.000000e+00> : vector<8x64xf32>
    %125 = tpu.matmul %115, %124, %cst_87 {dimension_numbers = #tpu.dot_dimension_numbers<[1], [0], [0], [1], [0, 0, 1, 1], [], []>} : vector<8x64xbf16>, vector<64x64xbf16>, vector<8x64xf32> -> vector<8x64xf32>
    %126 = arith.addf %122, %125 : vector<8x64xf32>
    %c0_88 = arith.constant 0 : index
    %c0_89 = arith.constant 0 : index
    %127 = vector.load %arg11[%c0_88, %c0_89] : memref<1x64xf32, #tpu.memory_space<vmem>>, vector<1x64xf32>
    %128 = vector.broadcast %127 : vector<1x64xf32> to vector<8x64xf32>
    %129 = arith.addf %126, %128 : vector<8x64xf32>
    %130 = arith.addf %129, %85 : vector<8x64xf32>
    %c0_90 = arith.constant 0 : index
    %c0_91 = arith.constant 0 : index
    %c0_92 = arith.constant 0 : index
    %131 = vector.load %arg16[%c0_90, %c0_91, %c0_92] : memref<1x8x64xf32, #tpu.memory_space<vmem>>, vector<1x8x64xf32>
    %132 = vector.shape_cast %131 : vector<1x8x64xf32> to vector<8x64xf32>
    %133 = vector.shape_cast %130 : vector<8x64xf32> to vector<1x8x64xf32>
    tpu.vector_store %arg16[%c0_90, %c0_91, %c0_92], %133 {strides = array<i32>} : memref<1x8x64xf32, #tpu.memory_space<vmem>>, vector<1x8x64xf32>,
    return
  }
  func.func @transform_0(%arg0: i32) -> (i32, i32, i32) {
    %c0_i32 = arith.constant 0 : i32
    %c0_i32_0 = arith.constant 0 : i32
    %c0_i32_1 = arith.constant 0 : i32
    return %arg0, %c0_i32, %c0_i32_0 : i32, i32, i32
  }
  func.func @transform_1(%arg0: i32) -> (i32, i32, i32) {
    %c0_i32 = arith.constant 0 : i32
    %c0_i32_0 = arith.constant 0 : i32
    %c0_i32_1 = arith.constant 0 : i32
    %c0_i32_2 = arith.constant 0 : i32
    return %c0_i32, %c0_i32_0, %c0_i32_1 : i32, i32, i32
  }
  func.func @transform_2(%arg0: i32) -> (i32, i32) {
    %c0_i32 = arith.constant 0 : i32
    %c0_i32_0 = arith.constant 0 : i32
    %c0_i32_1 = arith.constant 0 : i32
    return %c0_i32, %c0_i32_0 : i32, i32
  }
  func.func @transform_3(%arg0: i32) -> (i32, i32, i32) {
    %c0_i32 = arith.constant 0 : i32
    %c0_i32_0 = arith.constant 0 : i32
    %c0_i32_1 = arith.constant 0 : i32
    %c0_i32_2 = arith.constant 0 : i32
    return %c0_i32, %c0_i32_0, %c0_i32_1 : i32, i32, i32
  }
  func.func @transform_4(%arg0: i32) -> (i32, i32) {
    %c0_i32 = arith.constant 0 : i32
    %c0_i32_0 = arith.constant 0 : i32
    %c0_i32_1 = arith.constant 0 : i32
    return %c0_i32, %c0_i32_0 : i32, i32
  }
  func.func @transform_5(%arg0: i32) -> (i32, i32, i32) {
    %c0_i32 = arith.constant 0 : i32
    %c0_i32_0 = arith.constant 0 : i32
    %c0_i32_1 = arith.constant 0 : i32
    %c0_i32_2 = arith.constant 0 : i32
    return %c0_i32, %c0_i32_0, %c0_i32_1 : i32, i32, i32
  }
  func.func @transform_6(%arg0: i32) -> (i32, i32) {
    %c0_i32 = arith.constant 0 : i32
    %c0_i32_0 = arith.constant 0 : i32
    %c0_i32_1 = arith.constant 0 : i32
    return %c0_i32, %c0_i32_0 : i32, i32
  }
  func.func @transform_7(%arg0: i32) -> (i32, i32, i32) {
    %c0_i32 = arith.constant 0 : i32
    %c0_i32_0 = arith.constant 0 : i32
    %c0_i32_1 = arith.constant 0 : i32
    %c0_i32_2 = arith.constant 0 : i32
    return %c0_i32, %c0_i32_0, %c0_i32_1 : i32, i32, i32
  }
  func.func @transform_8(%arg0: i32) -> (i32, i32) {
    %c0_i32 = arith.constant 0 : i32
    %c0_i32_0 = arith.constant 0 : i32
    %c0_i32_1 = arith.constant 0 : i32
    return %c0_i32, %c0_i32_0 : i32, i32
  }
  func.func @transform_9(%arg0: i32) -> (i32, i32, i32) {
    %c0_i32 = arith.constant 0 : i32
    %c0_i32_0 = arith.constant 0 : i32
    %c0_i32_1 = arith.constant 0 : i32
    %c0_i32_2 = arith.constant 0 : i32
    return %c0_i32, %c0_i32_0, %c0_i32_1 : i32, i32, i32
  }
  func.func @transform_10(%arg0: i32) -> (i32, i32) {
    %c0_i32 = arith.constant 0 : i32
    %c0_i32_0 = arith.constant 0 : i32
    %c0_i32_1 = arith.constant 0 : i32
    return %c0_i32, %c0_i32_0 : i32, i32
  }
  func.func @transform_11(%arg0: i32) -> (i32, i32) {
    %c0_i32 = arith.constant 0 : i32
    %c0_i32_0 = arith.constant 0 : i32
    %c0_i32_1 = arith.constant 0 : i32
    return %c0_i32, %c0_i32_0 : i32, i32
  }
  func.func @transform_12(%arg0: i32) -> (i32, i32) {
    %c0_i32 = arith.constant 0 : i32
    %c0_i32_0 = arith.constant 0 : i32
    %c0_i32_1 = arith.constant 0 : i32
    return %c0_i32, %c0_i32_0 : i32, i32
  }
  func.func @transform_13(%arg0: i32) -> (i32, i32) {
    %c0_i32 = arith.constant 0 : i32
    %c0_i32_0 = arith.constant 0 : i32
    %c0_i32_1 = arith.constant 0 : i32
    return %c0_i32, %c0_i32_0 : i32, i32
  }
  func.func @transform_14(%arg0: i32) -> (i32, i32) {
    %c0_i32 = arith.constant 0 : i32
    %c0_i32_0 = arith.constant 0 : i32
    %c0_i32_1 = arith.constant 0 : i32
    return %c0_i32, %c0_i32_0 : i32, i32
  }
  func.func @transform_15(%arg0: i32) -> (i32, i32, i32) {
    %c0_i32 = arith.constant 0 : i32
    %c0_i32_0 = arith.constant 0 : i32
    %c0_i32_1 = arith.constant 0 : i32
    return %arg0, %c0_i32, %c0_i32_0 : i32, i32, i32
  }
}

</mosaic_0001>

<bundles_post_ra>
// kernel: tile.27
= control target key start
LH: loop header
LB: loop body
LE: loop exit
PB: predicated region body
PF: predicated region fallthrough
CT: control target
= control target key end

     0   :  { %s67_s10 = smov 56   ;;  %s68_s11 = smov 40   ;;  %vm3_vm0 = vcmask 64512   ;;  %vm9_vm1 = vcmask 523712   ;;  %vm15_vm2 = vcmask 458112   ;;  %vm21_vm3 = vcmask 392512   ;;  %s111_s0 = inlined_call_operand.vmem [shape: f32[8,8], index: 0, kind: input, shape index: {}]   ;;  %s112_s1 = inlined_call_operand.vmem [shape: f32[1,64], index: 1, kind: output, shape index: {}]  }
   0x1   :  { %v53_v0 = vld [vmem:[%s111_s0 + $0x7] sm:$0x1]   ;;  %v55_v1 = vld [vmem:[%s111_s0 + $0x5] sm:$0x1]   ;;  %v57_v2 = vld [vmem:[%s111_s0 + $0x3] sm:$0x1]  }
   0x2   :  { %7 = vrot.lane.b32.xlu0 %v53_v0, %s67_s10  ;;  %19 = vrot.lane.b32.xlu1 %v55_v1, %s68_s11  ;;  %s69_s14 = smov 24   ;;  %v54_v3 = vld [vmem:[%s111_s0 + $0x6] sm:$0x1]   ;;  %v56_v4 = vld [vmem:[%s111_s0 + $0x4] sm:$0x1]   ;;  %s70_s21 = smov 48  }
   0x3   :  { %31 = vrot.lane.b32.xlu2 %v57_v2, %s69_s14  ;;  %v58_v5 = vld [vmem:[%s111_s0 + $0x2] sm:$0x1]   ;;  %s71_s22 = smov 32   ;;  %s72_s23 = smov 16   ;;  %v59_v6 = vld [vmem:[%s111_s0 + $0x1] sm:$0x1]  }
   0x4   :  { %s73_s26 = smov 8   ;;  %v2_v7 = vld [vmem:[%s111_s0] sm:$0x1]   ;;  %vm27_vm4 = vcmask 326912   ;;  %vm33_vm5 = vcmask 261312   ;;  %vm39_vm6 = vcmask 195712  }
   0x5   :  { %4 = vst.msk [vmem:[#allocation0] sm:$0x1] %vm3_vm0, %v2_v7   ;;  %vm45_vm7 = vcmask 130112  }
   0xa   :  { %13 = vrot.lane.b32.xlu0 %v54_v3, %s70_s21  ;;  %25 = vrot.lane.b32.xlu1 %v56_v4, %s71_s22 }
   0xb   :  { %37 = vrot.lane.b32.xlu2 %v58_v5, %s72_s23 }
  0x12   :  { %43 = vrot.lane.b32.xlu0 %v59_v6, %s73_s26 }
  0x5d   :  { %v32_v8 = vpop.permute.xlu2 %31  }
  0x65   :  { %v38_v9 = vpop.permute.xlu2 %37  }
  0x74   :  { %v8_v10 = vpop.permute.xlu0 %7   ;;  %v20_v11 = vpop.permute.xlu1 %19  }
  0x75   :  { %10 = vst.msk [vmem:[#allocation0] sm:$0x1] %vm9_vm1, %v8_v10  }
  0x7c   :  { %v14_v12 = vpop.permute.xlu0 %13   ;;  %v26_v13 = vpop.permute.xlu1 %25  }
  0x7d   :  { %16 = vst.msk [vmem:[#allocation0] sm:$0x1] %vm15_vm2, %v14_v12  }
  0x7e   :  { %22 = vst.msk [vmem:[#allocation0] sm:$0x1] %vm21_vm3, %v20_v11  }
  0x7f   :  { %28 = vst.msk [vmem:[#allocation0] sm:$0x1] %vm27_vm4, %v26_v13  }
  0x80   :  { %34 = vst.msk [vmem:[#allocation0] sm:$0x1] %vm33_vm5, %v32_v8  }
  0x81   :  { %40 = vst.msk [vmem:[#allocation0] sm:$0x1] %vm39_vm6, %v38_v9  }
  0x84   :  { %v44_v14 = vpop.permute.xlu0 %43  }
  0x85   :  { %46 = vst.msk [vmem:[#allocation0] sm:$0x1] %vm45_vm7, %v44_v14  }
  0x8c   :  { %v49_v15 = vld [vmem:[#allocation0] sm:$0x1] }
  0x8d   :  { %52 = vst [vmem:[%s112_s1] sm:$0x1] %v49_v15 }

// kernel: tile.23
= control target key start
LH: loop header
LB: loop body
LE: loop exit
PB: predicated region body
PF: predicated region fallthrough
CT: control target
= control target key end

     0   :  { %s131_s10 = smov 120   ;;  %s132_s11 = smov 104   ;;  %vm3_vm0 = vcmask 64512   ;;  %vm9_vm1 = vcmask 1048512   ;;  %vm15_vm2 = vcmask 982912   ;;  %vm21_vm3 = vcmask 917312   ;;  %s207_s0 = inlined_call_operand.vmem [shape: f32[16,8], index: 0, kind: input, shape index: {}]   ;;  %s208_s1 = inlined_call_operand.vmem [shape: f32[1,128], index: 1, kind: output, shape index: {}]  }
   0x1   :  { %v101_v0 = vld [vmem:[%s207_s0 + $0xf] sm:$0x1]   ;;  %v103_v1 = vld [vmem:[%s207_s0 + $0xd] sm:$0x1]   ;;  %v105_v2 = vld [vmem:[%s207_s0 + $0xb] sm:$0x1]  }
   0x2   :  { %7 = vrot.lane.b32.xlu0 %v101_v0, %s131_s10  ;;  %19 = vrot.lane.b32.xlu1 %v103_v1, %s132_s11  ;;  %s133_s14 = smov 88   ;;  %v102_v3 = vld [vmem:[%s207_s0 + $0xe] sm:$0x1]   ;;  %v104_v4 = vld [vmem:[%s207_s0 + $0xc] sm:$0x1]   ;;  %s134_s19 = smov 112  }
   0x3   :  { %31 = vrot.lane.b32.xlu2 %v105_v2, %s133_s14  ;;  %s135_s20 = smov 96   ;;  %v106_v5 = vld [vmem:[%s207_s0 + $0xa] sm:$0x1]   ;;  %s136_s23 = smov 80   ;;  %v107_v6 = vld [vmem:[%s207_s0 + $0x9] sm:$0x1]  }
   0x4   :  { %v108_v7 = vld [vmem:[%s207_s0 + $0x8] sm:$0x1]   ;;  %s137_s28 = smov 72   ;;  %s138_s29 = smov 64   ;;  %v109_v8 = vld [vmem:[%s207_s0 + $0x7] sm:$0x1]  }
   0x5   :  { %s139_s3 = smov 56   ;;  %v110_v9 = vld [vmem:[%s207_s0 + $0x6] sm:$0x1]   ;;  %v111_v10 = vld [vmem:[%s207_s0 + $0x5] sm:$0x1]   ;;  %s140_s8 = smov 48  }
   0x6   :  { %s141_s9 = smov 40   ;;  %v112_v11 = vld [vmem:[%s207_s0 + $0x4] sm:$0x1]   ;;  %s142_s12 = smov 32   ;;  %v113_v12 = vld [vmem:[%s207_s0 + $0x3] sm:$0x1]  }
   0x7   :  { %v114_v13 = vld [vmem:[%s207_s0 + $0x2] sm:$0x1]   ;;  %s143_s17 = smov 24   ;;  %s144_s18 = smov 16   ;;  %v115_v14 = vld [vmem:[%s207_s0 + $0x1] sm:$0x1]  }
   0x8   :  { %s145_s21 = smov 8   ;;  %v2_v15 = vld [vmem:[%s207_s0] sm:$0x1]   ;;  %vm27_vm4 = vcmask 851712   ;;  %vm33_vm5 = vcmask 786112   ;;  %vm39_vm6 = vcmask 720512  }
   0x9   :  { %4 = vst.msk [vmem:[#allocation0] sm:$0x1] %vm3_vm0, %v2_v15   ;;  %vm45_vm7 = vcmask 654912   ;;  %vm51_vm8 = vcmask 589312   ;;  %vm57_vm9 = vcmask 523712   ;;  %vm63_vm10 = vcmask 458112  }
   0xa   :  { %13 = vrot.lane.b32.xlu0 %v102_v3, %s134_s19  ;;  %25 = vrot.lane.b32.xlu1 %v104_v4, %s135_s20  ;;  %vm69_vm11 = vcmask 392512   ;;  %vm75_vm12 = vcmask 326912   ;;  %vm81_vm13 = vcmask 261312   ;;  %vm87_vm14 = vcmask 195712  }
   0xb   :  { %37 = vrot.lane.b32.xlu2 %v106_v5, %s136_s23  ;;  %vm93_vm15 = vcmask 130112  }
  0x12   :  { %43 = vrot.lane.b32.xlu0 %v107_v6, %s137_s28  ;;  %49 = vrot.lane.b32.xlu1 %v108_v7, %s138_s29 }
  0x13   :  { %55 = vrot.lane.b32.xlu2 %v109_v8, %s139_s3 }
  0x1a   :  { %61 = vrot.lane.b32.xlu0 %v110_v9, %s140_s8  ;;  %67 = vrot.lane.b32.xlu1 %v111_v10, %s141_s9 }
  0x1b   :  { %73 = vrot.lane.b32.xlu2 %v112_v11, %s142_s12 }
  0x22   :  { %79 = vrot.lane.b32.xlu0 %v113_v12, %s143_s17  ;;  %85 = vrot.lane.b32.xlu1 %v114_v13, %s144_s18 }
  0x23   :  { %91 = vrot.lane.b32.xlu2 %v115_v14, %s145_s21 }
  0x5d   :  { %v32_v16 = vpop.permute.xlu2 %31  }
  0x65   :  { %v38_v17 = vpop.permute.xlu2 %37  }
  0x6d   :  { %v56_v18 = vpop.permute.xlu2 %55  }
  0x74   :  { %v8_v19 = vpop.permute.xlu0 %7   ;;  %v20_v20 = vpop.permute.xlu1 %19  }
  0x75   :  { %10 = vst.msk [vmem:[#allocation0] sm:$0x1] %vm9_vm1, %v8_v19   ;;  %v74_v21 = vpop.permute.xlu2 %73  }
  0x7c   :  { %v14_v22 = vpop.permute.xlu0 %13   ;;  %v26_v23 = vpop.permute.xlu1 %25  }
  0x7d   :  { %16 = vst.msk [vmem:[#allocation0] sm:$0x1] %vm15_vm2, %v14_v22   ;;  %v92_v24 = vpop.permute.xlu2 %91  }
  0x7e   :  { %22 = vst.msk [vmem:[#allocation0] sm:$0x1] %vm21_vm3, %v20_v20  }
  0x7f   :  { %28 = vst.msk [vmem:[#allocation0] sm:$0x1] %vm27_vm4, %v26_v23  }
  0x80   :  { %34 = vst.msk [vmem:[#allocation0] sm:$0x1] %vm33_vm5, %v32_v16  }
  0x81   :  { %40 = vst.msk [vmem:[#allocation0] sm:$0x1] %vm39_vm6, %v38_v17  }
  0x84   :  { %v44_v25 = vpop.permute.xlu0 %43   ;;  %v50_v26 = vpop.permute.xlu1 %49  }
  0x85   :  { %46 = vst.msk [vmem:[#allocation0] sm:$0x1] %vm45_vm7, %v44_v25  }
  0x86   :  { %52 = vst.msk [vmem:[#allocation0] sm:$0x1] %vm51_vm8, %v50_v26  }
  0x87   :  { %58 = vst.msk [vmem:[#allocation0] sm:$0x1] %vm57_vm9, %v56_v18  }
  0x8c   :  { %v62_v27 = vpop.permute.xlu0 %61   ;;  %v68_v28 = vpop.permute.xlu1 %67  }
  0x8d   :  { %64 = vst.msk [vmem:[#allocation0] sm:$0x1] %vm63_vm10, %v62_v27  }
  0x8e   :  { %70 = vst.msk [vmem:[#allocation0] sm:$0x1] %vm69_vm11, %v68_v28  }
  0x8f   :  { %76 = vst.msk [vmem:[#allocation0] sm:$0x1] %vm75_vm12, %v74_v21  }
  0x94   :  { %v80_v29 = vpop.permute.xlu0 %79   ;;  %v86_v30 = vpop.permute.xlu1 %85  }
  0x95   :  { %82 = vst.msk [vmem:[#allocation0] sm:$0x1] %vm81_vm13, %v80_v29  }
  0x96   :  { %88 = vst.msk [vmem:[#allocation0] sm:$0x1] %vm87_vm14, %v86_v30  }
  0x97   :  { %94 = vst.msk [vmem:[#allocation0] sm:$0x1] %vm93_vm15, %v92_v24  }
  0x9e   :  { %v97_v31 = vld [vmem:[#allocation0] sm:$0x1] }
  0x9f   :  { %100 = vst [vmem:[%s208_s1] sm:$0x1] %v97_v31 }

// kernel: tile.22
= control target key start
LH: loop header
LB: loop body
LE: loop exit
PB: predicated region body
PF: predicated region fallthrough
CT: control target
= control target key end

     0   :  { %s28_s0 = inlined_call_operand.vmem [shape: f32[8], index: 0, kind: input, shape index: {}]   ;;  %s29_s1 = inlined_call_operand.vmem [shape: f32[16,8], index: 1, kind: output, shape index: {}]  }
   0x1   :  { %v4_v0 = vld [vmem:[%s28_s0] ss:$0 sm:$0xff] }
   0x2   :  { %5 = vst [vmem:[%s29_s1] sm:$0xff] %v4_v0 }
   0x3   :  { %8 = vst [vmem:[%s29_s1 + $0x8] sm:$0xff] %v4_v0 }

// kernel: tile.26
= control target key start
LH: loop header
LB: loop body
LE: loop exit
PB: predicated region body
PF: predicated region fallthrough
CT: control target
= control target key end

     0   :  { %s22_s0 = inlined_call_operand.vmem [shape: f32[8], index: 0, kind: input, shape index: {}]   ;;  %s23_s1 = inlined_call_operand.vmem [shape: f32[8,8], index: 1, kind: output, shape index: {}]  }
   0x1   :  { %v4_v0 = vld [vmem:[%s22_s0] ss:$0 sm:$0xff] }
   0x2   :  { %5 = vst [vmem:[%s23_s1] sm:$0xff] %v4_v0 }

// kernel: conv_sequence_forward.1
= control target key start
LH: loop header
LB: loop body
LE: loop exit
PB: predicated region body
PF: predicated region fallthrough
CT: control target
= control target key end

     0   :  { %s2893_s0 = inlined_call_operand.vmem [shape: bf16[2,16,64], index: 0, kind: input, shape index: {}]   ;;  %s2894_s1 = inlined_call_operand.hbm [shape: bf16[3,64,128], index: 1, kind: input, shape index: {}]   ;;  %s2895_s2 = inlined_call_operand.vmem [shape: f32[1,128], index: 2, kind: input, shape index: {}]   ;;  %s2896_s3 = inlined_call_operand.vmem [shape: bf16[3,64,64], index: 3, kind: input, shape index: {}]   ;;  %s2897_s4 = inlined_call_operand.vmem [shape: f32[1,64], index: 4, kind: input, shape index: {}]   ;;  %s2898_s5 = inlined_call_operand.vmem [shape: bf16[3,64,64], index: 5, kind: input, shape index: {}]   ;;  %s2899_s6 = inlined_call_operand.vmem [shape: f32[1,64], index: 6, kind: input, shape index: {}]   ;;  %s2900_s7 = inlined_call_operand.vmem [shape: bf16[3,64,64], index: 7, kind: input, shape index: {}]   ;;  %s2901_s8 = inlined_call_operand.vmem [shape: f32[1,64], index: 8, kind: input, shape index: {}]   ;;  %s2902_s9 = inlined_call_operand.vmem [shape: bf16[3,64,64], index: 9, kind: input, shape index: {}]   ;;  %s2903_s10 = inlined_call_operand.vmem [shape: f32[1,64], index: 10, kind: input, shape index: {}]   ;;  %s2904_s11 = inlined_call_operand.vmem [shape: bf16[8,16], index: 11, kind: input, shape index: {}]   ;;  %s2905_s12 = inlined_call_operand.hbm [shape: bf16[128,64], index: 12, kind: input, shape index: {}]   ;;  %s2906_s13 = inlined_call_operand.hbm [shape: bf16[128,64], index: 13, kind: input, shape index: {}]   ;;  %s2907_s14 = inlined_call_operand.hbm [shape: bf16[128,64], index: 14, kind: input, shape index: {}]   ;;  %s2908_s15 = inlined_call_operand.vmem [shape: f32[2,8,64], index: 15, kind: output, shape index: {}]  }
   0x1   :  { %2910 = sst [smem:[#allocation13_spill]] %s2894_s1 }
   0x2   :  { %2911 = sst [smem:[#allocation14_spill]] %s2905_s12 }
   0x3   :  { %2912 = sst [smem:[#allocation15_spill]] %s2908_s15 }
   0x4   :  { %20 = vsyncpa [#allocation3], 0 }
   0x5   :  { %21 = vsyncpa [#allocation5], 0 }
   0x6   :  { %22 = vsyncpa [#allocation8], 0  ;;  %s2603_s18 = smov 0  }
   0x7 LB: > { %2913 = sst [smem:[#allocation12_spill]] %s2515_s18  ;;  %s2609_s19 = sadd.s32 4294967295, %s2515_s18   ;;  %s2515_s18 = sphi %s2603_s18, %s28_s18  }
   0x8   : > { %p1799_p0 = scmp.ge.s32.totalorder %s2515_s18, 1  ;;  %p379_p1 = scmp.lt.s32.totalorder %s2515_s18, 3 }
   0x9   : > { %p2350_p2 = scmp.eq.s32.totalorder %s2609_s19, 0  ;;  %s2914_s12 = sld [smem:[#allocation14_spill]] }
   0xa   : > { %p2617_p3 = pnand %p1799_p0, %p379_p1  ;;  %s2916_s1 = sld [smem:[#allocation13_spill]] }
   0xb   : > { %s2517_s27 = smov [#allocation4]   ;;  %s2518_s30 = smov [#allocation2]  }
   0xc   : > { %p2337_p4 = pneg %p2617_p3  ;;  %s436_s28 = sshll.u32 %s2517_s27, 4  ;;  %s437_s28 = int_to_ptr.vmem [resolvable:$true] %s436_s28 }
   0xd   : > { %s392_s16 = sshll.u32 %s2518_s30, 4  ;;  %s448_s21 = sshll.u32 %s2906_s13, 4  ;;  %s393_s16 = int_to_ptr.vmem [resolvable:$true] %s392_s16  ;;  %s449_s21 = int_to_ptr.hbm [resolvable:$true] %s448_s21 }
   0xe   : > { %p2628_p5 = pnand %p2350_p2, %p2337_p4  ;;  %s2519_s24 = smov 64  }
   0xf   : > { %s434_s22 = sshll.u32 %s2914_s12, 4  ;;  %s2520_s25 = smov 4   ;;  %s435_s22 = int_to_ptr.hbm [resolvable:$true] %s434_s22 }
  0x10   : > { %s390_s26 = sshll.u32 %s2916_s1, 4  ;;  %s2521_s27 = smov [#allocation6]   ;;  %s391_s26 = int_to_ptr.hbm [resolvable:$true] %s390_s26 }
  0x11   : > { %2343 = dma.hbm_to_vmem [thread:$0]  (!%p2628_p5), %s435_s22, 1024, %s437_s28, [#allocation5], %s2519_s24, %s2519_s24, %s2520_s25  }
  0x12   : > { %2340 = dma.hbm_to_vmem [thread:$0]  (!%p2628_p5), %s391_s26, 1536, %s393_s16, [#allocation3], %s2519_s24, %s2519_s24, %s2520_s25  }
  0x13   : > { %s450_s1 = sshll.u32 %s2521_s27, 4  ;;  %s462_s15 = sshll.u32 %s2907_s14, 4  ;;  %s451_s1 = int_to_ptr.vmem [resolvable:$true] %s450_s1  ;;  %s463_s15 = int_to_ptr.hbm [resolvable:$true] %s462_s15 }
  0x14   : > { %2346 = dma.hbm_to_vmem [thread:$0]  (!%p2628_p5), %s449_s21, 1024, %s451_s1, [#allocation5], %s2519_s24, %s2519_s24, %s2520_s25  }
  0x15   : > { %s2522_s30 = smov [#allocation7]   ;;  %488 = sbr.rel (%p2617_p3) target bundleno = 1089 (0x441), region = 80 }
  0x16   : > { %s464_s17 = sshll.u32 %s2522_s30, 4  ;;  %s465_s17 = int_to_ptr.vmem [resolvable:$true] %s464_s17 }
  0x17   : > { %2349 = dma.hbm_to_vmem [thread:$0]  (!%p2628_p5), %s463_s15, 1024, %s465_s17, [#allocation8], %s2519_s24, %s2519_s24, %s2520_s25  }
  0x1a   : > { %2502 = dma.done.wait (%p2350_p2), [#allocation3], 1536  }
  0x1b   : > { %2504 = vsyncadd (%p2350_p2), [#allocation3], 4294965760 }
  0x1c   : > { %2506 = dma.done.wait (%p2350_p2), [#allocation5], 2048  }
  0x1d   : > { %2508 = vsyncadd (%p2350_p2), [#allocation5], 4294965248 }
  0x1e   : > { %2510 = dma.done.wait (%p2350_p2), [#allocation8], 1024  }
  0x1f   : > { %2512 = vsyncadd (%p2350_p2), [#allocation8], 4294966272  ;;  %p551_p6 = scmp.lt.s32.totalorder %s2609_s19, 1  ;;  %v2244_v0 = vld [vmem:[#allocation2 + $0x38] sm:$0xff]  ;;  %v2243_v3 = vld [vmem:[#allocation2 + $0x30] sm:$0xff]  ;;  %vm576_vm0 = vcmask 1040384  }
  0x20   : > { %v2240_v1 = vld [vmem:[#allocation2 + $0x18] sm:$0xff]  ;;  %635 = vmatpush.bf16.msra.mxu0 %v2244_v0  ;;  %v2239_v4 = vld [vmem:[#allocation2 + $0x10] sm:$0xff]  ;;  %v2242_v7 = vld [vmem:[#allocation2 + $0x28] sm:$0xff]  ;;  %vm577_vm1 = vsmask.f32 256  ;;  %vm583_vm2 = vcmask 1047552  }
  0x21   : > { %s2925_s19 = smov (!%p551_p6, %s2609_s19), 1  ;;  %v2248_v2 = vld [vmem:[#allocation2 + $0x58] sm:$0xff]  ;;  %676 = vmatpush.bf16.msra.mxu1 %v2240_v1  ;;  %v2247_v5 = vld [vmem:[#allocation2 + $0x50] sm:$0xff]  ;;  %v2238_v8 = vld [vmem:[#allocation2 + $0x8] sm:$0xff]  ;;  %vm584_vm3 = vsmask.f32 7424 }
  0x22   : > { %s2235_s1 = sshll.u32 %s2925_s19, 3  ;;  %726 = vmatpush.bf16.msra.mxu2 %v2248_v2  ;;  %v2246_v11 = vld [vmem:[#allocation2 + $0x48] sm:$0xff]  ;;  %v2241_v14 = vld [vmem:[#allocation2 + $0x20] sm:$0xff]  ;;  %vm2671_vm4 = vmand %vm576_vm0, %vm577_vm1  ;;  %vm628_vm6 = vcmask 523264   ;;  %vm753_vm7 = vcmask 1046528   ;;  %vm766_vm8 = vcmask 130048  }
  0x23   : > { %s555_s18 = scalar_lea.vmem %s2893_s0, %s2235_s1  ;;  %v2237_v15 = vld [vmem:[#allocation2] sm:$0xff]  ;;  %vm585_vm5 = vmand %vm583_vm2, %vm584_vm3  ;;  %v2264_v22 = vld [vmem:[#allocation6 + $0x38] sm:$0xff]  ;;  %vm1034_vm9 = vcmask 1043456   ;;  %vm1035_vm10 = vsmask.f32 3328  ;;  %s2922_s15 = sld [smem:[#allocation15_spill]] }
  0x24   : > { %v2236_v6 = vld [vmem:[%s555_s18] sm:$0xff]  ;;  %636 = vmatpush.bf16.msra.mxu0 %v2243_v3  ;;  %v2272_v23 = vld [vmem:[#allocation7 + $0x38] sm:$0xff]  ;;  %v2263_v26 = vld [vmem:[#allocation6 + $0x30] sm:$0xff] }
  0x25   : > { %677 = vmatpush.bf16.msra.mxu1 %v2239_v4  ;;  %v569_v9 = vshrl.u32 %v2236_v6, 16  ;;  %v572_v10 = vshll.u32 %v2236_v6, 16  ;;  %v2245_v17 = vld [vmem:[#allocation2 + $0x40] sm:$0xff]  ;;  %v2271_v27 = vld [vmem:[#allocation7 + $0x30] sm:$0xff]  ;;  %v2262_v29 = vld [vmem:[#allocation6 + $0x28] sm:$0xff] }
  0x26   : > { %727 = vmatpush.bf16.msra.mxu2 %v2247_v5  ;;  %v2270_v30 = vld [vmem:[#allocation7 + $0x28] sm:$0xff]  ;;  %v2372_v33 = vld [vmem:[%s2895_s2] ss:$0 sm:$0xff]  ;;  %v2260_v40 = vld [vmem:[#allocation6 + $0x18] sm:$0xff] }
  0x27   : > { %v571_v12 = vrot.slane %v569_v9, 7  ;;  %v580_v13 = vrot.slane %v572_v10, 1  ;;  %v2261_v34 = vld [vmem:[#allocation6 + $0x20] sm:$0xff]  ;;  %v2268_v41 = vld [vmem:[#allocation7 + $0x18] sm:$0xff]  ;;  %v2259_v46 = vld [vmem:[#allocation6 + $0x10] sm:$0xff] }
  0x28   : > { %637 = vmatpush.bf16.msra.mxu0 %v2242_v7  ;;  %v2269_v35 = vld [vmem:[#allocation7 + $0x20] sm:$0xff]  ;;  %v2267_v47 = vld [vmem:[#allocation7 + $0x10] sm:$0xff]  ;;  %v2258_v54 = vld [vmem:[#allocation6 + $0x8] sm:$0xff] }
  0x29   : > { %678 = vmatpush.bf16.msra.mxu1 %v2238_v8  ;;  %v574_v16 = vor.u32 %v572_v10, %v571_v12  ;;  %v581_v19 = vor.u32 %v580_v13, %v569_v9  ;;  %v2266_v55 = vld [vmem:[#allocation7 + $0x8] sm:$0xff]  ;;  %v2256_v61 = vld [vmem:[#allocation4 + $0x38] sm:$0xff]  ;;  %v764_v63 = vld [vmem:[%s2904_s11] sm:$0xf]  ;;  %s559_s18 = scalar_lea.vmem %s2922_s15, %s2235_s1 }
  0x2a   : > { %728 = vmatpush.bf16.msra.mxu2 %v2246_v11  ;;  %v2255_v0 = vld [vmem:[#allocation4 + $0x30] sm:$0xff]  ;;  %v2254_v1 = vld [vmem:[#allocation4 + $0x28] sm:$0xff]  ;;  %v2253_v2 = vld [vmem:[#allocation4 + $0x20] sm:$0xff] }
  0x2b   : > { %v579_v20 = vsel %vm2671_vm4, 0, %v574_v16  ;;  %v586_v21 = vsel %vm585_vm5, %v581_v19, 0  ;;  %v2252_v3 = vld [vmem:[#allocation4 + $0x18] sm:$0xff]  ;;  %v2251_v4 = vld [vmem:[#allocation4 + $0x10] sm:$0xff]  ;;  %v2250_v5 = vld [vmem:[#allocation4 + $0x8] sm:$0xff] }
  0x2c   : > { %638 = vmatpush.bf16.msra.mxu0 %v2241_v14  ;;  %v2257_v7 = vld [vmem:[#allocation6] sm:$0xff]  ;;  %v2280_v9 = vld [vmem:[%s2896_s3 + $0x38] sm:$0xff]  ;;  %v2279_v13 = vld [vmem:[%s2896_s3 + $0x30] sm:$0xff] }
  0x2d   : > { %679 = vmatpush.bf16.msra.mxu1 %v2237_v15  ;;  %v2265_v8 = vld [vmem:[#allocation7] sm:$0xff]  ;;  %v2278_v14 = vld [vmem:[%s2896_s3 + $0x28] sm:$0xff]  ;;  %v2284_v15 = vld [vmem:[%s2896_s3 + $0x58] sm:$0xff] }
  0x2e   : > { %729 = vmatpush.bf16.msra.mxu2 %v2245_v17  ;;  %v2277_v16 = vld [vmem:[%s2896_s3 + $0x20] sm:$0xff]  ;;  %v2283_v17 = vld [vmem:[%s2896_s3 + $0x50] sm:$0xff]  ;;  %v2276_v19 = vld [vmem:[%s2896_s3 + $0x18] sm:$0xff] }
  0x2f   : > { %1833 = vmatmul.msk.bf16.vlgmr.msra.gmra.mxu0 %vm628_vm6, %v2236_v6  ;;  %v2249_v6 = vld [vmem:[#allocation4] sm:$0xff]  ;;  %vm2728_vm11 = vmand %vm1034_vm9, %vm1035_vm10 }
  0x30   : > { %1850 = vmatmul.msk.bf16.vlgmr.msra.gmra.mxu1 %vm628_vm6, %v579_v20  ;;  %925 = vmatpush.bf16.msrb.mxu0 %v2264_v22  ;;  %v2282_v20 = vld [vmem:[%s2896_s3 + $0x48] sm:$0xff]  ;;  %v2281_v22 = vld [vmem:[%s2896_s3 + $0x40] sm:$0xff] }
  0x31   : > { %1867 = vmatmul.msk.bf16.vlgmr.msra.gmra.mxu2 %vm628_vm6, %v586_v21  ;;  %1002 = vmatpush.bf16.msrb.mxu1 %v2272_v23  ;;  %v2275_v21 = vld [vmem:[%s2896_s3 + $0x10] sm:$0xff]  ;;  %v2274_v23 = vld [vmem:[%s2896_s3 + $0x8] sm:$0xff] }
  0x32   : > { %1086 = vmatpush.bf16.msrb.mxu2 %v2280_v9 }
  0x34   : > { %926 = vmatpush.bf16.msrb.mxu0 %v2263_v26 }
  0x35   : > { %1003 = vmatpush.bf16.msrb.mxu1 %v2271_v27 }
  0x36   : > { %1087 = vmatpush.bf16.msrb.mxu2 %v2279_v13 }
  0x38   : > { %927 = vmatpush.bf16.msrb.mxu0 %v2262_v29 }
  0x39   : > { %1004 = vmatpush.bf16.msrb.mxu1 %v2270_v30 }
  0x3a   : > { %1088 = vmatpush.bf16.msrb.mxu2 %v2278_v14 }
  0x3c   : > { %928 = vmatpush.bf16.msrb.mxu0 %v2261_v34 }
  0x3d   : > { %1005 = vmatpush.bf16.msrb.mxu1 %v2269_v35 }
  0x3e   : > { %1089 = vmatpush.bf16.msrb.mxu2 %v2277_v16  ;;  %v2304_v16 = vld [vmem:[%s2900_s7 + $0x38] sm:$0xff] }
  0x40   : > { %929 = vmatpush.bf16.msrb.mxu0 %v2260_v40 }
  0x41   : > { %1006 = vmatpush.bf16.msrb.mxu1 %v2268_v41 }
  0x42   : > { %1126 = vmatpush.bf16.msra.mxu2 %v2276_v19  ;;  %v2302_v19 = vld [vmem:[%s2900_s7 + $0x28] sm:$0xff] }
  0x44   : > { %930 = vmatpush.bf16.msrb.mxu0 %v2259_v46  ;;  %v2292_v46 = vld [vmem:[%s2898_s5 + $0x38] sm:$0xff] }
  0x45   : > { %1007 = vmatpush.bf16.msrb.mxu1 %v2267_v47  ;;  %v2291_v47 = vld [vmem:[%s2898_s5 + $0x30] sm:$0xff] }
  0x46   : > { %1127 = vmatpush.bf16.msra.mxu2 %v2275_v21  ;;  %v2308_v21 = vld [vmem:[%s2900_s7 + $0x58] sm:$0xff] }
  0x48   : > { %931 = vmatpush.bf16.msrb.mxu0 %v2258_v54  ;;  %v2294_v54 = vld [vmem:[%s2898_s5 + $0x48] sm:$0xff] }
  0x49   : > { %1008 = vmatpush.bf16.msrb.mxu1 %v2266_v55  ;;  %v2286_v55 = vld [vmem:[%s2898_s5 + $0x8] sm:$0xff] }
  0x4a   : > { %1128 = vmatpush.bf16.msra.mxu2 %v2274_v23  ;;  %v2299_v23 = vld [vmem:[%s2900_s7 + $0x10] sm:$0xff] }
  0x4c   : > { %932 = vmatpush.bf16.msrb.mxu0 %v2257_v7 }
  0x4d   : > { %1009 = vmatpush.bf16.msrb.mxu1 %v2265_v8 }
  0x50   : > { %1256 = vmatpush.bf16.msra.mxu0 %v2292_v46 }
  0x54   : > { %1257 = vmatpush.bf16.msra.mxu0 %v2291_v47 }
  0xac   : > { %v640_v24 = vpop.f32.mrf.mxu0 }
  0xad   : > { %v681_v25 = vpop.f32.mrf.mxu1 }
  0xae   : > { %v682_v28 = vadd.f32 %v681_v25, %v640_v24  ;;  %v2273_v24 = vld [vmem:[%s2896_s3] sm:$0xff] }
  0xaf   : > { %1129 = vmatpush.bf16.msra.mxu2 %v2273_v24  ;;  %v2307_v24 = vld [vmem:[%s2900_s7 + $0x50] sm:$0xff] }
  0xb4   : > { %v731_v31 = vpop.f32.mrf.mxu2  ;;  %v642_v36 = vpop.f32.mrf.mxu0 }
  0xb5   : > { %v736_v32 = vadd.f32 %v731_v31, %v682_v28  ;;  %v683_v37 = vpop.f32.mrf.mxu1 }
  0xb6   : > { %v684_v39 = vadd.f32 %v683_v37, %v642_v36 }
  0xb7   : > { %v742_v38 = vadd.f32 %v2372_v33, %v736_v32 }
  0xb9   : > { %v747_v44 = vrot.slane %v742_v38, 7  ;;  %v754_v50 = vrot.slane %v742_v38, 1 }
  0xbb   : > { %v752_v49 = vsel %vm576_vm0, %v742_v38, %v747_v44 }
  0xbc   : > { %v733_v42 = vpop.f32.mrf.mxu2  ;;  %v760_v56 = vmax.f32 %v742_v38, %v752_v49  ;;  %v2296_v49 = vld [vmem:[%s2898_s5 + $0x58] sm:$0xff] }
  0xbd   : > { %v737_v43 = vadd.f32 %v733_v42, %v684_v39 }
  0xbf   : > { %v743_v45 = vadd.f32 %v2372_v33, %v737_v43 }
  0xc1   : > { %v748_v48 = vrot.slane %v743_v45, 7  ;;  %v755_v51 = vrot.slane %v743_v45, 1 }
  0xc3   : > { %v749_v52 = vsel %vm576_vm0, %v747_v44, %v748_v48  ;;  %v756_v53 = vsel %vm753_vm7, %v754_v50, %v755_v51  ;;  %v759_v58 = vsel %vm753_vm7, %v755_v51, %v743_v45  ;;  %v2290_v48 = vld [vmem:[%s2898_s5 + $0x28] sm:$0xff]  ;;  %v2288_v50 = vld [vmem:[%s2898_s5 + $0x18] sm:$0xff]  ;;  %v2289_v51 = vld [vmem:[%s2898_s5 + $0x20] sm:$0xff] }
  0xc4   : > { %v761_v57 = vmax.f32 %v743_v45, %v749_v52  ;;  %v762_v59 = vmax.f32 %v760_v56, %v756_v53  ;;  %1258 = vmatpush.bf16.msra.mxu0 %v2290_v48  ;;  %1296 = vmatpush.bf16.msra.mxu1 %v2288_v50  ;;  %v2295_v52 = vld [vmem:[%s2898_s5 + $0x50] sm:$0xff] }
  0xc5   : > { %v2287_v53 = vld [vmem:[%s2898_s5 + $0x10] sm:$0xff] }
  0xc6   : > { %v763_v60 = vmax.f32 %v761_v57, %v759_v58  ;;  %v2293_v57 = vld [vmem:[%s2898_s5 + $0x40] sm:$0xff] }
  0xc7   : > { %v2285_v58 = vld [vmem:[%s2898_s5] sm:$0xff] }
  0xc8   : > { %v765_v62 = vpack.c.bf16 %v763_v60, %v762_v59  ;;  %1259 = vmatpush.bf16.msra.mxu0 %v2289_v51  ;;  %1297 = vmatpush.bf16.msra.mxu1 %v2287_v53  ;;  %v2316_v53 = vld [vmem:[%s2902_s9 + $0x38] sm:$0xff] }
  0xca   : > { %777 = vmatpush.bf16.msra.mxu3 %v765_v62 }
  0xcc   : > { %1298 = vmatpush.bf16.msra.mxu1 %v2286_v55  ;;  %v2314_v55 = vld [vmem:[%s2902_s9 + $0x28] sm:$0xff] }
  0xcd   : > { %1868 = vmatmul.msk.bf16.vlgmr.msra.gmra.mxu3 %vm766_vm8, %v764_v63  ;;  %v2373_v63 = vld [vmem:[%s2897_s4] ss:$0 sm:$0xff] }
  0xce   : > { %848 = vmatpush.bf16.msrb.mxu3 %v2256_v61 }
  0xd0   : > { %1299 = vmatpush.bf16.msra.mxu1 %v2285_v58  ;;  %v2313_v58 = vld [vmem:[%s2902_s9 + $0x20] sm:$0xff] }
  0xd2   : > { %849 = vmatpush.bf16.msrb.mxu3 %v2255_v0 }
  0xd6   : > { %850 = vmatpush.bf16.msrb.mxu3 %v2254_v1 }
  0xda   : > { %851 = vmatpush.bf16.msrb.mxu3 %v2253_v2 }
  0xde   : > { %852 = vmatpush.bf16.msrb.mxu3 %v2252_v3 }
  0xe2   : > { %853 = vmatpush.bf16.msrb.mxu3 %v2251_v4 }
  0xe6   : > { %854 = vmatpush.bf16.msrb.mxu3 %v2250_v5 }
  0xea   : > { %855 = vmatpush.bf16.msrb.mxu3 %v2249_v6 }
  0xee   : > { %1175 = vmatpush.bf16.msra.mxu3 %v2284_v15 }
  0xf2   : > { %1176 = vmatpush.bf16.msra.mxu3 %v2283_v17  ;;  %v2303_v17 = vld [vmem:[%s2900_s7 + $0x30] sm:$0xff] }
  0xf6   : > { %1177 = vmatpush.bf16.msra.mxu3 %v2282_v20  ;;  %v2300_v20 = vld [vmem:[%s2900_s7 + $0x18] sm:$0xff] }
  0xfa   : > { %1178 = vmatpush.bf16.msra.mxu3 %v2281_v22  ;;  %v2301_v22 = vld [vmem:[%s2900_s7 + $0x20] sm:$0xff] }
 0x150   : > { %v779_v10 = vpop.f32.mrf.mxu3 }
 0x151   : > { %v783_v11 = vpack.c.bf16 %v779_v10, %v779_v10 }
 0x153   : > { %856 = vmatmul.bf16.vlgmr.msrb.gmra.mxu3 %v783_v11  ;;  %933 = vmatmul.bf16.vlgmr.msrb.gmra.mxu0 %v783_v11 }
 0x154   : > { %1010 = vmatmul.bf16.vlgmr.msrb.gmra.mxu1 %v783_v11  ;;  %1427 = vmatpush.bf16.msrb.mxu3 %v2304_v16 }
 0x155   : > { %1467 = vmatpush.bf16.msrb.mxu0 %v2300_v20  ;;  %1516 = vmatpush.bf16.msrb.mxu1 %v2308_v21 }
 0x158   : > { %v781_v12 = vpop.f32.mrf.mxu3  ;;  %1428 = vmatpush.bf16.msrb.mxu3 %v2303_v17 }
 0x159   : > { %1468 = vmatpush.bf16.msrb.mxu0 %v2299_v23  ;;  %1517 = vmatpush.bf16.msrb.mxu1 %v2307_v24 }
 0x15c   : > { %1429 = vmatpush.bf16.msrb.mxu3 %v2302_v19 }
 0x160   : > { %1430 = vmatpush.bf16.msrb.mxu3 %v2301_v22 }
 0x1d0   : > { %v934_v25 = vpop.f32.mrf.mxu0 }
 0x1d1   : > { %v1011_v26 = vpop.f32.mrf.mxu1 }
 0x1d6   : > { %v857_v27 = vpop.f32.mrf.mxu3 }
 0x1d7   : > { %v1015_v28 = vmax.f32 %v857_v27, %v934_v25  ;;  %v2298_v25 = vld [vmem:[%s2900_s7 + $0x8] sm:$0xff] }
 0x1d8   : > { %v936_v29 = vpop.f32.mrf.mxu0  ;;  %1469 = vmatpush.bf16.msrb.mxu0 %v2298_v25 }
 0x1d9   : > { %v2724_v30 = vmax.f32 %v1015_v28, %v1011_v26  ;;  %v1013_v31 = vpop.f32.mrf.mxu1  ;;  %v2306_v26 = vld [vmem:[%s2900_s7 + $0x48] sm:$0xff]  ;;  %v2297_v28 = vld [vmem:[%s2900_s7] sm:$0xff] }
 0x1da   : > { %1518 = vmatpush.bf16.msrb.mxu1 %v2306_v26  ;;  %v2305_v29 = vld [vmem:[%s2900_s7 + $0x40] sm:$0xff] }
 0x1db   : > { %v1017_v32 = vmax.f32 %v2724_v30, 0.0 }
 0x1dc   : > { %1470 = vmatpush.bf16.msrb.mxu0 %v2297_v28 }
 0x1dd   : > { %v1018_v33 = vpack.c.bf16 %v1017_v32, %v1017_v32 }
 0x1de   : > { %v859_v34 = vpop.f32.mrf.mxu3  ;;  %1519 = vmatpush.bf16.msrb.mxu1 %v2305_v29  ;;  %v2376_v29 = vld [vmem:[%s2903_s10] ss:$0 sm:$0xff] }
 0x1df   : > { %v1020_v35 = vunpack.c.l.b16 %v1018_v33  ;;  %1989 = vmatmul.msk.bf16.vlgmr.msrb.gmra.mxu2 %vm628_vm6, %v1018_v33  ;;  %v2374_v34 = vld [vmem:[%s2899_s6] ss:$0 sm:$0xff] }
 0x1e0   : > { %1345 = vmatpush.bf16.msrb.mxu2 %v2296_v49 }
 0x1e1   : > { %v1021_v36 = vpack.c.b16 %v1020_v35, %v1020_v35 }
 0x1e3   : > { %v1023_v37 = vshrl.u32 %v1021_v36, 16  ;;  %v1026_v38 = vshll.u32 %v1021_v36, 16 }
 0x1e4   : > { %1346 = vmatpush.bf16.msrb.mxu2 %v2295_v52 }
 0x1e5   : > { %v1031_v39 = vrot.slane %v1026_v38, 1  ;;  %v1025_v41 = vrot.slane %v1023_v37, 7 }
 0x1e7   : > { %v1032_v42 = vor.u32 %v1031_v39, %v1023_v37  ;;  %v1028_v44 = vor.u32 %v1026_v38, %v1025_v41 }
 0x1e8   : > { %1347 = vmatpush.bf16.msrb.mxu2 %v2294_v54  ;;  %v2315_v54 = vld [vmem:[%s2902_s9 + $0x30] sm:$0xff] }
 0x1e9   : > { %v1037_v43 = vsel %vm2728_vm11, %v1032_v42, 0  ;;  %v1030_v45 = vsel %vm2671_vm4, 0, %v1028_v44 }
 0x1ea   : > { %2031 = vmatmul.msk.bf16.vlgmr.msra.gmra.mxu3 %vm628_vm6, %v1037_v43 }
 0x1ec   : > { %1348 = vmatpush.bf16.msrb.mxu2 %v2293_v57  ;;  %v2320_v57 = vld [vmem:[%s2902_s9 + $0x58] sm:$0xff] }
 0x1ef   : > { %2006 = vmatmul.msk.bf16.vlgmr.msra.gmra.mxu2 %vm628_vm6, %v1030_v45 }
 0x1f0   : > { %1597 = vmatpush.bf16.msra.mxu2 %v2316_v53 }
 0x1f4   : > { %1598 = vmatpush.bf16.msra.mxu2 %v2315_v54 }
 0x1f8   : > { %1599 = vmatpush.bf16.msra.mxu2 %v2314_v55 }
 0x1fc   : > { %1600 = vmatpush.bf16.msra.mxu2 %v2313_v58 }
 0x262   : > { %v1091_v56 = vpop.f32.mrf.mxu2 }
 0x26a   : > { %v1093_v59 = vpop.f32.mrf.mxu2 }
 0x26b   : > { %v2311_v59 = vld [vmem:[%s2902_s9 + $0x10] sm:$0xff] }
 0x26d   : > { %v1180_v60 = vpop.f32.mrf.mxu3 }
 0x272   : > { %v1131_v61 = vpop.f32.mrf.mxu2 }
 0x273   : > { %v1132_v62 = vadd.f32 %v1131_v61, %v1091_v56  ;;  %v2312_v56 = vld [vmem:[%s2902_s9 + $0x18] sm:$0xff]  ;;  %v2310_v61 = vld [vmem:[%s2902_s9 + $0x8] sm:$0xff] }
 0x274   : > { %1637 = vmatpush.bf16.msra.mxu3 %v2312_v56 }
 0x275   : > { %v1184_v0 = vadd.f32 %v1180_v60, %v1132_v62  ;;  %v1182_v1 = vpop.f32.mrf.mxu3  ;;  %v2319_v60 = vld [vmem:[%s2902_s9 + $0x50] sm:$0xff]  ;;  %v2318_v62 = vld [vmem:[%s2902_s9 + $0x48] sm:$0xff] }
 0x277   : > { %v1189_v2 = vadd.f32 %v2373_v63, %v1184_v0  ;;  %v2309_v63 = vld [vmem:[%s2902_s9] sm:$0xff] }
 0x278   : > { %1638 = vmatpush.bf16.msra.mxu3 %v2311_v59  ;;  %v2317_v0 = vld [vmem:[%s2902_s9 + $0x40] sm:$0xff] }
 0x279   : > { %v1190_v3 = vmax.f32 %v1189_v2, 0.0 }
 0x27a   : > { %v1133_v4 = vpop.f32.mrf.mxu2 }
 0x27b   : > { %v1191_v5 = vpack.c.bf16 %v1190_v3, %v1190_v3 }
 0x27c   : > { %1639 = vmatpush.bf16.msra.mxu3 %v2310_v61 }
 0x27d   : > { %v1193_v6 = vunpack.c.l.b16 %v1191_v5  ;;  %2056 = vmatmul.msk.bf16.vlgmr.msra.gmra.mxu0 %vm628_vm6, %v1191_v5  ;;  %v2375_v5 = vld [vmem:[%s2901_s8] ss:$0 sm:$0xff] }
 0x27e   : > { %1686 = vmatpush.bf16.msra.mxu0 %v2320_v57 }
 0x27f   : > { %v1194_v7 = vpack.c.b16 %v1193_v6, %v1193_v6 }
 0x280   : > { %1640 = vmatpush.bf16.msra.mxu3 %v2309_v63 }
 0x281   : > { %v1196_v8 = vshrl.u32 %v1194_v7, 16  ;;  %v1199_v9 = vshll.u32 %v1194_v7, 16 }
 0x282   : > { %1687 = vmatpush.bf16.msra.mxu0 %v2319_v60 }
 0x283   : > { %v1198_v10 = vrot.slane %v1196_v8, 7  ;;  %v1204_v11 = vrot.slane %v1199_v9, 1 }
 0x285   : > { %v1201_v12 = vor.u32 %v1199_v9, %v1198_v10  ;;  %v1205_v13 = vor.u32 %v1204_v11, %v1196_v8 }
 0x286   : > { %1688 = vmatpush.bf16.msra.mxu0 %v2318_v62 }
 0x287   : > { %v1203_v14 = vsel %vm2671_vm4, 0, %v1201_v12  ;;  %v1207_v15 = vsel %vm2728_vm11, %v1205_v13, 0 }
 0x288   : > { %2073 = vmatmul.msk.bf16.vlgmr.msra.gmra.mxu1 %vm628_vm6, %v1203_v14  ;;  %2098 = vmatmul.msk.bf16.vlgmr.msrb.gmra.mxu2 %vm628_vm6, %v1207_v15 }
 0x28a   : > { %1689 = vmatpush.bf16.msra.mxu0 %v2317_v0 }
 0x2fa   : > { %v1261_v27 = vpop.f32.mrf.mxu0 }
 0x302   : > { %v1263_v31 = vpop.f32.mrf.mxu0 }
 0x305   : > { %v1301_v32 = vpop.f32.mrf.mxu1 }
 0x306   : > { %v1302_v33 = vadd.f32 %v1301_v32, %v1261_v27 }
 0x30b   : > { %v1350_v35 = vpop.f32.mrf.mxu2 }
 0x30c   : > { %v1354_v36 = vadd.f32 %v1350_v35, %v1302_v33 }
 0x30d   : > { %v1303_v37 = vpop.f32.mrf.mxu1 }
 0x30e   : > { %v1359_v38 = vadd.f32 %v2374_v34, %v1354_v36 }
 0x310   : > { %v2824_v39 = vadd.f32 %v1359_v38, %v2724_v30 }
 0x312   : > { %v1361_v41 = vmax.f32 %v2824_v39, 0.0 }
 0x313   : > { %v1352_v42 = vpop.f32.mrf.mxu2 }
 0x314   : > { %v1362_v43 = vpack.c.bf16 %v1361_v41, %v1361_v41 }
 0x316   : > { %v1364_v44 = vunpack.c.l.b16 %v1362_v43  ;;  %2123 = vmatmul.msk.bf16.vlgmr.msrb.gmra.mxu3 %vm628_vm6, %v1362_v43 }
 0x318   : > { %v1365_v45 = vpack.c.b16 %v1364_v44, %v1364_v44 }
 0x31a   : > { %v1367_v46 = vshrl.u32 %v1365_v45, 16  ;;  %v1370_v47 = vshll.u32 %v1365_v45, 16 }
 0x31c   : > { %v1369_v48 = vrot.slane %v1367_v46, 7  ;;  %v1375_v49 = vrot.slane %v1370_v47, 1 }
 0x31e   : > { %v1372_v50 = vor.u32 %v1370_v47, %v1369_v48  ;;  %v1376_v51 = vor.u32 %v1375_v49, %v1367_v46 }
 0x320   : > { %v1374_v52 = vsel %vm2671_vm4, 0, %v1372_v50  ;;  %v1378_v30 = vsel %vm2728_vm11, %v1376_v51, 0 }
 0x321   : > { %2140 = vmatmul.msk.bf16.vlgmr.msrb.gmra.mxu0 %vm628_vm6, %v1374_v52  ;;  %2165 = vmatmul.msk.bf16.vlgmr.msrb.gmra.mxu1 %vm628_vm6, %v1378_v30 }
 0x399   : > { %v1432_v1 = vpop.f32.mrf.mxu3 }
 0x39e   : > { %v1472_v2 = vpop.f32.mrf.mxu0  ;;  %v1521_v3 = vpop.f32.mrf.mxu1 }
 0x39f   : > { %v1473_v4 = vadd.f32 %v1472_v2, %v1432_v1 }
 0x3a1   : > { %v1525_v6 = vadd.f32 %v1521_v3, %v1473_v4  ;;  %v1434_v7 = vpop.f32.mrf.mxu3 }
 0x3a3   : > { %v1530_v8 = vadd.f32 %v2375_v5, %v1525_v6 }
 0x3a5   : > { %v1531_v9 = vmax.f32 %v1530_v8, 0.0 }
 0x3a6   : > { %v1474_v10 = vpop.f32.mrf.mxu0  ;;  %v1523_v11 = vpop.f32.mrf.mxu1 }
 0x3a7   : > { %v1532_v12 = vpack.c.bf16 %v1531_v9, %v1531_v9 }
 0x3a9   : > { %v1534_v13 = vunpack.c.l.b16 %v1532_v12  ;;  %2190 = vmatmul.msk.bf16.vlgmr.msra.gmra.mxu2 %vm628_vm6, %v1532_v12 }
 0x3ab   : > { %v1535_v14 = vpack.c.b16 %v1534_v13, %v1534_v13 }
 0x3ad   : > { %v1537_v15 = vshrl.u32 %v1535_v14, 16  ;;  %v1540_v16 = vshll.u32 %v1535_v14, 16 }
 0x3af   : > { %v1539_v17 = vrot.slane %v1537_v15, 7  ;;  %v1545_v19 = vrot.slane %v1540_v16, 1 }
 0x3b1   : > { %v1542_v20 = vor.u32 %v1540_v16, %v1539_v17  ;;  %v1546_v21 = vor.u32 %v1545_v19, %v1537_v15 }
 0x3b3   : > { %v1544_v22 = vsel %vm2671_vm4, 0, %v1542_v20  ;;  %v1548_v23 = vsel %vm2728_vm11, %v1546_v21, 0 }
 0x3b4   : > { %2207 = vmatmul.msk.bf16.vlgmr.msra.gmra.mxu3 %vm628_vm6, %v1544_v22  ;;  %2232 = vmatmul.msk.bf16.vlgmr.msra.gmra.mxu0 %vm628_vm6, %v1548_v23 }
 0x42c   : > { %v1602_v24 = vpop.f32.mrf.mxu2 }
 0x431   : > { %v1691_v25 = vpop.f32.mrf.mxu0 }
 0x434   : > { %v1604_v26 = vpop.f32.mrf.mxu2 }
 0x437   : > { %v1642_v27 = vpop.f32.mrf.mxu3 }
 0x438   : > { %v1643_v28 = vadd.f32 %v1642_v27, %v1602_v24 }
 0x439   : > { %v1693_v31 = vpop.f32.mrf.mxu0 }
 0x43a   : > { %v1695_v32 = vadd.f32 %v1691_v25, %v1643_v28 }
 0x43c   : > { %v1700_v18 = vadd.f32 %v2376_v29, %v1695_v32 }
 0x43e   : > { %v1701_v40 = vadd.f32 %v1700_v18, %v2824_v39 }
 0x43f   : > { %v1644_v33 = vpop.f32.mrf.mxu3 }
 0x440   : > { %1702 = vst.msk [vmem:[%s559_s18] sm:$0xff] %vm628_vm6, %v1701_v40 }
 0x441 PF: > { %s2923_s22 = sld [smem:[#allocation12_spill]] }
 0x447   : > { %s28_s18 = sadd.s32 1, %s2923_s22  }
 0x448   : > { %p25_p7 = scmp.ge.s32.totalorder %s28_s18, 4  }
 0x44a   :  { %27 = sbr.rel (!%p25_p7) target bundleno = 7 (0x7), region = 137 }
 0x44f   :  { %1722 = vsyncpa [#allocation3], 1 }
 0x450   :  { %1724 = vsyncpa [#allocation3 + $0x1], 1 }
 0x451   :  { %1725 = vsyncpa [#allocation5], 1 }
 0x452   :  { %1726 = vsyncpa [#allocation8], 1 }

</bundles_post_ra>
